<compile_context>
chip_gen: v6e
topology: v6e:2x2x1
jax: 0.10.0
libtpu: 0.0.40
codegen_flags: <defaults>
</compile_context>

<pallas_src>
import functools
import math

import jax
import jax.numpy as jnp
from jax.experimental import pallas as pl
from jax.experimental.pallas import tpu as pltpu


# ----------------------------------------------------------------------------
# per-generation configuration & helpers
# ----------------------------------------------------------------------------

@functools.lru_cache(maxsize=1)
def _hw_config():
    """VMEM budget / tile preferences per TPU generation (v5e/v6e: 128 MiB VMEM, v7x: 64)."""
    vmem_bytes = 64 * 1024 * 1024
    try:
        vmem_bytes = int(getattr(pltpu.get_tpu_info(), "vmem_capacity_bytes"))
    except Exception:
        pass
    if vmem_bytes >= 100 * 1024 * 1024:            # v5e / v6e (128 MiB physical VMEM)
        return dict(vmem_limit=96 * 1024 * 1024, tm=256, tn=512, tk_inner=512,
                    tq=256, tkv=512, deep_weight_buffers=True)
    # v7x (64 MiB physical VMEM / 32 MiB scoped default)
    return dict(vmem_limit=40 * 1024 * 1024, tm=128, tn=512, tk_inner=512,
                tq=128, tkv=256, deep_weight_buffers=False)


def _cparams(*semantics):
    return pltpu.CompilerParams(
        dimension_semantics=semantics,
        vmem_limit_bytes=_hw_config()["vmem_limit"],
    )


def _round_up(x, m):
    return ((x + m - 1) // m) * m


def _pick_tile(dim, preferred, aligns=(256, 128)):
    """Largest multiple of one of `aligns` (tried in order) dividing `dim` and <= preferred;
    the whole axis if dim <= preferred."""
    if dim <= preferred:
        return dim
    for a in aligns:
        t = (preferred // a) * a
        while t >= a:
            if dim % t == 0:
                return t
            t -= a
    return dim  # awkward dim: whole axis resident (row dims are padded by the caller)


def _weight_spec(block, index_map):
    """Streamed-weight BlockSpec; deeper buffering on high-VMEM chips (v5e/v6e) to hide the
    per-tile weight DMA behind compute."""
    if _hw_config()["deep_weight_buffers"] and hasattr(pl, "Buffered"):
        try:
            return pl.BlockSpec(block, index_map, pipeline_mode=pl.Buffered(3))
        except Exception:
            pass
    return pl.BlockSpec(block, index_map)


# ----------------------------------------------------------------------------
# Pallas kernels
# ----------------------------------------------------------------------------

def _ln_qkv_kernel(x_ref, g_ref, b_ref, w_ref, bias_ref, o_ref, xn_ref):
    """LayerNorm(x) @ W + bias.  LN computed once per row tile (j == 0) into a bf16 VMEM
    scratch and reused for all output column tiles."""
    @pl.when(pl.program_id(1) == 0)
    def _():
        x = x_ref[...]
        mu = jnp.mean(x, axis=-1, keepdims=True)
        var = jnp.mean(jnp.square(x - mu), axis=-1, keepdims=True)
        xn_ref[...] = ((x - mu) * jax.lax.rsqrt(var + 1e-5) * g_ref[...]
                       + b_ref[...]).astype(xn_ref.dtype)

    o_ref[...] = (jnp.dot(xn_ref[...], w_ref[...], preferred_element_type=jnp.float32)
                  + bias_ref[...]).astype(o_ref.dtype)


def _make_flash_attn_kernel(n_heads, D, Dh):
    """Flash-style masked MHA: online softmax over kv blocks, heads accumulated into a
    (tq, D) f32 scratch, one lane-dense (tq, D) store per query tile."""
    def kernel(q_ref, kv_ref, mask_ref, o_ref, m_sc, l_sc, acc_sc):
        ki = pl.program_id(2)

        @pl.when(ki == 0)
        def _():
            m_sc[...] = jnp.full(m_sc.shape, -jnp.inf, dtype=m_sc.dtype)
            l_sc[...] = jnp.zeros(l_sc.shape, dtype=l_sc.dtype)
            acc_sc[...] = jnp.zeros(acc_sc.shape, dtype=acc_sc.dtype)

        neg = mask_ref[...]                                   # (1, tk) additive key mask
        for h in range(n_heads):                              # static head loop, no concat
            q = q_ref[:, h * Dh:(h + 1) * Dh]                 # (tq, Dh) bf16, scale folded
            k = kv_ref[:, h * Dh:(h + 1) * Dh]                # (tk, Dh) bf16
            v = kv_ref[:, D + h * Dh:D + (h + 1) * Dh]        # (tk, Dh) bf16
            s = jax.lax.dot_general(q, k, (((1,), (1,)), ((), ())),
                                    preferred_element_type=jnp.float32)   # (tq, tk)
            s = s + neg
            m_prev = m_sc[:, h:h + 1]
            m_new = jnp.maximum(m_prev, jnp.max(s, axis=-1, keepdims=True))
            alpha = jnp.exp(m_prev - m_new)
            p = jnp.exp(s - m_new)
            l_sc[:, h:h + 1] = alpha * l_sc[:, h:h + 1] + jnp.sum(p, axis=-1, keepdims=True)
            acc_sc[:, h * Dh:(h + 1) * Dh] = (
                alpha * acc_sc[:, h * Dh:(h + 1) * Dh]
                + jnp.dot(p.astype(jnp.bfloat16), v, preferred_element_type=jnp.float32))
            m_sc[:, h:h + 1] = m_new

        @pl.when(ki == pl.num_programs(2) - 1)
        def _():
            for h in range(n_heads):
                inv = pl.reciprocal(l_sc[:, h:h + 1], approx=True)
                acc_sc[:, h * Dh:(h + 1) * Dh] = acc_sc[:, h * Dh:(h + 1) * Dh] * inv
            o_ref[...] = acc_sc[...].astype(o_ref.dtype)      # single lane-dense store

    return kernel


def _out_resid_ln_kernel(a_ref, w_ref, b_ref, r_ref, g_ref, beta_ref,
                         y_ref, h_ref, acc_ref):
    """K-tiled: y = attn @ W_out + b + residual ;  h = LayerNorm(y)."""
    k = pl.program_id(1)

    @pl.when(k == 0)
    def _():
        acc_ref[...] = jnp.zeros_like(acc_ref)

    acc_ref[...] += jnp.dot(a_ref[...], w_ref[...], preferred_element_type=jnp.float32)

    @pl.when(k == pl.num_programs(1) - 1)
    def _():
        y = acc_ref[...] + b_ref[...] + r_ref[...]
        y_ref[...] = y
        mu = jnp.mean(y, axis=-1, keepdims=True)
        var = jnp.mean(jnp.square(y - mu), axis=-1, keepdims=True)
        h_ref[...] = ((y - mu) * jax.lax.rsqrt(var + 1e-5) * g_ref[...]
                      + beta_ref[...]).astype(h_ref.dtype)


def _linear_gelu_kernel(x_ref, w_ref, b_ref, o_ref):
    y = jnp.dot(x_ref[...], w_ref[...], preferred_element_type=jnp.float32) + b_ref[...]
    # TODO(synk): PyTorch nn.GELU defaults to exact erf; tanh approximation used here.
    o_ref[...] = jax.nn.gelu(y, approximate=True).astype(o_ref.dtype)


def _ffn2_resid_head_kernel(h_ref, w2_ref, b2_ref, y_ref, wc_ref, bc_ref,
                            o_ref, acc_ref):
    """K-tiled: x = h @ W_ffn2 + b + residual ;  logits = x @ W_cls(padded) + b_cls."""
    k = pl.program_id(1)

    @pl.when(k == 0)
    def _():
        acc_ref[...] = jnp.zeros_like(acc_ref)

    acc_ref[...] += jnp.dot(h_ref[...], w2_ref[...], preferred_element_type=jnp.float32)

    @pl.when(k == pl.num_programs(1) - 1)
    def _():
        xf = acc_ref[...] + b2_ref[...] + y_ref[...]
        o_ref[...] = (jnp.dot(xf.astype(jnp.bfloat16), wc_ref[...],
                              preferred_element_type=jnp.float32) + bc_ref[...])


# ----------------------------------------------------------------------------
# pallas_call wrappers
# ----------------------------------------------------------------------------

def pallas_ln_qkv(x, g, b, w, bias, *, tm):
    """x: [M, D] f32 -> LayerNorm -> @ w [D, N] bf16 -> [M, N] bf16 (LN cached per row tile)."""
    M, D = x.shape
    N = w.shape[1]
    tn = _pick_tile(N, _hw_config()["tn"], (256, 128))
    return pl.pallas_call(
        _ln_qkv_kernel,
        out_shape=jax.ShapeDtypeStruct((M, N), jnp.bfloat16),
        grid=(M // tm, N // tn),
        in_specs=[
            pl.BlockSpec((tm, D), lambda i, j: (i, 0)),
            pl.BlockSpec((1, D), lambda i, j: (0, 0)),
            pl.BlockSpec((1, D), lambda i, j: (0, 0)),
            _weight_spec((D, tn), lambda i, j: (0, j)),
            pl.BlockSpec((1, tn), lambda i, j: (0, j)),
        ],
        out_specs=pl.BlockSpec((tm, tn), lambda i, j: (i, j)),
        scratch_shapes=[pltpu.VMEM((tm, D), jnp.bfloat16)],
        compiler_params=_cparams("parallel", "arbitrary"),
    )(x, g, b, w, bias)


def pallas_flash_attention(q3, kv3, neg_mask, *, n_heads):
    """Flash-style masked multi-head self-attention.

    q3       : [B, S, D]  bf16   (scale already folded into the Q projection weights)
    kv3      : [B, S, 2D] bf16   (K | V packed along the lane dim)
    neg_mask : [B, 1, S]  f32    additive key mask (0 keep / -1e9 pad)
    returns  : [B, S, D]  bf16
    """
    cfg = _hw_config()
    B, S, D = q3.shape
    Dh = D // n_heads

    if S <= cfg["tq"]:
        S_pad, tq = S, S
    else:
        S_pad, tq = _round_up(S, cfg["tq"]), cfg["tq"]
    tk = S_pad if S_pad <= cfg["tkv"] else _pick_tile(S_pad, cfg["tkv"], (256, 128))
    if S_pad != S:
        pad = S_pad - S
        q3 = jnp.pad(q3, ((0, 0), (0, pad), (0, 0)))
        kv3 = jnp.pad(kv3, ((0, 0), (0, pad), (0, 0)))
        neg_mask = jnp.pad(neg_mask, ((0, 0), (0, 0), (0, pad)), constant_values=-1e9)

    kernel = _make_flash_attn_kernel(n_heads, D, Dh)
    out = pl.pallas_call(
        kernel,
        out_shape=jax.ShapeDtypeStruct((B, S_pad, D), jnp.bfloat16),
        grid=(B, S_pad // tq, S_pad // tk),
        in_specs=[
            pl.BlockSpec((None, tq, D), lambda b, qi, ki: (b, qi, 0)),
            pl.BlockSpec((None, tk, 2 * D), lambda b, qi, ki: (b, ki, 0)),
            pl.BlockSpec((None, 1, tk), lambda b, qi, ki: (b, 0, ki)),
        ],
        out_specs=pl.BlockSpec((None, tq, D), lambda b, qi, ki: (b, qi, 0)),
        scratch_shapes=[
            pltpu.VMEM((tq, n_heads), jnp.float32),   # running max per head
            pltpu.VMEM((tq, n_heads), jnp.float32),   # running denom per head
            pltpu.VMEM((tq, D), jnp.float32),         # running numerator (all heads)
        ],
        compiler_params=_cparams("parallel", "parallel", "arbitrary"),
    )(q3, kv3, neg_mask)
    return out[:, :S, :] if S_pad != S else out


def pallas_attn_out_resid_ln(attn, w, b, resid, g, beta, *, tm):
    """Fused, K-tiled: out-proj + bias + residual add + LayerNorm2 -> (residual_stream, ln_out)."""
    M, D = resid.shape
    tk = _pick_tile(D, _hw_config()["tk_inner"], (256, 128))
    return pl.pallas_call(
        _out_resid_ln_kernel,
        out_shape=(jax.ShapeDtypeStruct((M, D), jnp.float32),
                   jax.ShapeDtypeStruct((M, D), jnp.bfloat16)),
        grid=(M // tm, D // tk),
        in_specs=[
            pl.BlockSpec((tm, tk), lambda i, k: (i, k)),
            _weight_spec((tk, D), lambda i, k: (k, 0)),
            pl.BlockSpec((1, D), lambda i, k: (0, 0)),
            pl.BlockSpec((tm, D), lambda i, k: (i, 0)),
            pl.BlockSpec((1, D), lambda i, k: (0, 0)),
            pl.BlockSpec((1, D), lambda i, k: (0, 0)),
        ],
        out_specs=(pl.BlockSpec((tm, D), lambda i, k: (i, 0)),
                   pl.BlockSpec((tm, D), lambda i, k: (i, 0))),
        scratch_shapes=[pltpu.VMEM((tm, D), jnp.float32)],
        compiler_params=_cparams("parallel", "arbitrary"),
    )(attn, w, b, resid, g, beta)


def pallas_linear_gelu(x, w, b, *, tm):
    """x: [M, K] bf16 @ w [K, N] bf16 + b -> GELU -> [M, N] bf16 (tiled over M, N)."""
    M, K = x.shape
    N = w.shape[1]
    tn = _pick_tile(N, _hw_config()["tn"], (256, 128))
    return pl.pallas_call(
        _linear_gelu_kernel,
        out_shape=jax.ShapeDtypeStruct((M, N), jnp.bfloat16),
        grid=(M // tm, N // tn),
        in_specs=[
            pl.BlockSpec((tm, K), lambda i, j: (i, 0)),
            _weight_spec((K, tn), lambda i, j: (0, j)),
            pl.BlockSpec((1, tn), lambda i, j: (0, j)),
        ],
        out_specs=pl.BlockSpec((tm, tn), lambda i, j: (i, j)),
        compiler_params=_cparams("parallel", "parallel"),
    )(x, w, b)


def pallas_ffn2_resid_head(h, w2, b2, resid, w_cls, b_cls, *, tm):
    """Fused, K-tiled: FFN2 + bias + residual, then classifier head (lane-dense padded output)."""
    M, F = h.shape
    D = resid.shape[1]
    NCP = w_cls.shape[1]
    tk = _pick_tile(F, _hw_config()["tk_inner"], (256, 128))
    return pl.pallas_call(
        _ffn2_resid_head_kernel,
        out_shape=jax.ShapeDtypeStruct((M, NCP), jnp.float32),
        grid=(M // tm, F // tk),
        in_specs=[
            pl.BlockSpec((tm, tk), lambda i, k: (i, k)),
            _weight_spec((tk, D), lambda i, k: (k, 0)),
            pl.BlockSpec((1, D), lambda i, k: (0, 0)),
            pl.BlockSpec((tm, D), lambda i, k: (i, 0)),
            pl.BlockSpec((D, NCP), lambda i, k: (0, 0)),
            pl.BlockSpec((1, NCP), lambda i, k: (0, 0)),
        ],
        out_specs=pl.BlockSpec((tm, NCP), lambda i, k: (i, 0)),
        scratch_shapes=[pltpu.VMEM((tm, D), jnp.float32)],
        compiler_params=_cparams("parallel", "arbitrary"),
    )(h, w2, b2, resid, w_cls, b_cls)


# ----------------------------------------------------------------------------
# Model: synthetic "text_transformer" + linear classifier head
# ----------------------------------------------------------------------------

def init_params(key, vocab, d_model, n_heads, d_ffn, n_classes):
    std = 0.02
    ks = jax.random.split(key, 6)
    bf16 = jnp.bfloat16
    ncp = max(128, _round_up(n_classes, 128))           # lane-dense padded head width

    w_qkv = jax.random.normal(ks[1], (d_model, 3 * d_model), jnp.float32) * std
    b_qkv = jnp.zeros((1, 3 * d_model), jnp.float32)
    # fold 1/sqrt(Dh) into the Q projection (one-time weight transform; removes the
    # per-step q upcast/scale/downcast from the attention kernel)
    scale = 1.0 / math.sqrt(d_model // n_heads)
    w_qkv = w_qkv.at[:, :d_model].multiply(scale)
    b_qkv = b_qkv.at[:, :d_model].multiply(scale)

    w_cls = jax.random.normal(ks[5], (d_model, ncp), jnp.float32) * std
    w_cls = w_cls.at[:, n_classes:].set(0.0)             # padded columns unused

    return {
        "embed":  jax.random.normal(ks[0], (vocab, d_model), jnp.float32) * std,
        "w_qkv":  w_qkv.astype(bf16),
        "b_qkv":  b_qkv,
        "w_out":  (jax.random.normal(ks[2], (d_model, d_model), jnp.float32) * std).astype(bf16),
        "b_out":  jnp.zeros((1, d_model), jnp.float32),
        "w_ffn1": (jax.random.normal(ks[3], (d_model, d_ffn), jnp.float32) * std).astype(bf16),
        "b_ffn1": jnp.zeros((1, d_ffn), jnp.float32),
        "w_ffn2": (jax.random.normal(ks[4], (d_ffn, d_model), jnp.float32) * std).astype(bf16),
        "b_ffn2": jnp.zeros((1, d_model), jnp.float32),
        "ln1_g":  jnp.ones((1, d_model), jnp.float32),
        "ln1_b":  jnp.zeros((1, d_model), jnp.float32),
        "ln2_g":  jnp.ones((1, d_model), jnp.float32),
        "ln2_b":  jnp.zeros((1, d_model), jnp.float32),
        "w_cls":  w_cls.astype(bf16),                    # nn.Linear(embed_dim, n_classes), padded
        "b_cls":  jnp.zeros((1, ncp), jnp.float32),
    }


@functools.partial(jax.jit, static_argnames=("n_heads", "n_classes"))
def custom_model_forward(params, input_ids, attention_mask, *, n_heads, n_classes):
    cfg = _hw_config()
    B, S = input_ids.shape
    D = params["embed"].shape[1]
    M = B * S

    # row tiling: pad M to a full tile multiple instead of whole-axis fallbacks
    if M >= cfg["tm"]:
        M_pad, tm = _round_up(M, cfg["tm"]), cfg["tm"]
    else:
        M_pad = _round_up(M, 16)
        tm = M_pad

    # --- text_transformer (synthetic 1-layer pre-LN encoder) ---
    x2d = params["embed"][input_ids].reshape(M, D)               # glue: gather (XLA)
    if M_pad != M:
        x2d = jnp.pad(x2d, ((0, M_pad - M), (0, 0)))

    # LN1 + QKV projection (fused, LN cached per row tile)
    qkv = pallas_ln_qkv(x2d, params["ln1_g"], params["ln1_b"],
                        params["w_qkv"], params["b_qkv"], tm=tm)  # [M_pad, 3D] bf16
    qkv3 = (qkv[:M] if M_pad != M else qkv).reshape(B, S, 3 * D)
    q3 = qkv3[:, :, :D]                                           # glue: slice (XLA)
    kv3 = qkv3[:, :, D:]

    # additive key mask precomputed once
    neg_mask = ((1.0 - attention_mask.astype(jnp.float32)) * jnp.float32(-1e9)
                ).reshape(B, 1, S)

    attn = pallas_flash_attention(q3, kv3, neg_mask, n_heads=n_heads)  # [B, S, D] bf16
    attn2d = attn.reshape(M, D)
    if M_pad != M:
        attn2d = jnp.pad(attn2d, ((0, M_pad - M), (0, 0)))

    # out-proj + residual + LN2 (fused, K-tiled)
    y, h_ln = pallas_attn_out_resid_ln(attn2d, params["w_out"], params["b_out"],
                                       x2d, params["ln2_g"], params["ln2_b"], tm=tm)

    # FFN1 + GELU (fused)
    h = pallas_linear_gelu(h_ln, params["w_ffn1"], params["b_ffn1"], tm=tm)

    # FFN2 + residual + classifier head (fused, K-tiled, lane-dense padded output)
    logits_pad = pallas_ffn2_resid_head(h, params["w_ffn2"], params["b_ffn2"],
                                        y, params["w_cls"], params["b_cls"], tm=tm)

    return logits_pad[:M, :n_classes].reshape(B, S, n_classes)


if __name__ == "__main__":
    B, S = 2, 8
    VOCAB, D, H, FFN, NCLS = 100, 32, 4, 64, 7

    key = jax.random.PRNGKey(0)
    kp, ki = jax.random.split(key)
    params = init_params(kp, VOCAB, D, H, FFN, NCLS)

    input_ids = jax.random.randint(ki, (B, S), 0, VOCAB, dtype=jnp.int32)
    attention_mask = jnp.ones((B, S), jnp.float32).at[1, 6:].set(0.0)  # pad tail of seq 1

    logits = custom_model_forward(params, input_ids, attention_mask,
                                  n_heads=H, n_classes=NCLS)
    jax.block_until_ready(logits)
    assert logits.shape == (B, S, NCLS), logits.shape
    assert bool(jnp.all(jnp.isfinite(logits)))
    print("KERNEL_OK")
</pallas_src>

<mosaic_0001>
module attributes {stable_mosaic.version = 11 : i64} {
  func.func @kernel(%arg0: i32, %arg1: i32, %arg2: i32, %arg3: memref<1x8x32xbf16, #tpu.memory_space<vmem>>, %arg4: memref<1x8x64xbf16, #tpu.memory_space<vmem>>, %arg5: memref<1x1x8xf32, #tpu.memory_space<vmem>>, %arg6: memref<1x8x32xbf16, #tpu.memory_space<vmem>>, %arg7: memref<8x4xf32, #tpu.memory_space<vmem>>, %arg8: memref<8x4xf32, #tpu.memory_space<vmem>>, %arg9: memref<8x32xf32, #tpu.memory_space<vmem>>) attributes {dimension_semantics = [#tpu.dimension_semantics<parallel>, #tpu.dimension_semantics<parallel>, #tpu.dimension_semantics<arbitrary>], iteration_bounds = array<i64: 2, 1, 1>, scalar_prefetch = 0 : i64, scratch_operands = 3 : i64, tpu.core_type = #tpu.core_type<tc>, window_params = [{transform_indices = @transform_0, window_bounds = array<i64: 1, 8, 32>}, {transform_indices = @transform_1, window_bounds = array<i64: 1, 8, 64>}, {transform_indices = @transform_2, window_bounds = array<i64: 1, 1, 8>}, {transform_indices = @transform_3, window_bounds = array<i64: 1, 8, 32>}]} {
    %c0_i32 = arith.constant 0 : i32
    %0 = arith.cmpi eq, %arg2, %c0_i32 : i32
    %1 = arith.extui %0 : i1 to i32
    %c0_i32_0 = arith.constant 0 : i32
    %2 = arith.cmpi ne, %1, %c0_i32_0 : i32
    scf.if %2 {
      %cst_94 = arith.constant 0xFF800000 : f32
      %136 = vector.broadcast %cst_94 : f32 to vector<8x4xf32>
      %c0_95 = arith.constant 0 : index
      %c0_96 = arith.constant 0 : index
      %137 = vector.load %arg7[%c0_95, %c0_96] : memref<8x4xf32, #tpu.memory_space<vmem>>, vector<8x4xf32>
      tpu.vector_store %arg7[%c0_95, %c0_96], %136 {strides = array<i32>} : memref<8x4xf32, #tpu.memory_space<vmem>>, vector<8x4xf32>,
      %cst_97 = arith.constant 0.000000e+00 : f32
      %138 = vector.broadcast %cst_97 : f32 to vector<8x4xf32>
      %c0_98 = arith.constant 0 : index
      %c0_99 = arith.constant 0 : index
      %139 = vector.load %arg8[%c0_98, %c0_99] : memref<8x4xf32, #tpu.memory_space<vmem>>, vector<8x4xf32>
      tpu.vector_store %arg8[%c0_98, %c0_99], %138 {strides = array<i32>} : memref<8x4xf32, #tpu.memory_space<vmem>>, vector<8x4xf32>,
      %cst_100 = arith.constant 0.000000e+00 : f32
      %140 = vector.broadcast %cst_100 : f32 to vector<8x32xf32>
      %c0_101 = arith.constant 0 : index
      %c0_102 = arith.constant 0 : index
      %141 = vector.load %arg9[%c0_101, %c0_102] : memref<8x32xf32, #tpu.memory_space<vmem>>, vector<8x32xf32>
      tpu.vector_store %arg9[%c0_101, %c0_102], %140 {strides = array<i32>} : memref<8x32xf32, #tpu.memory_space<vmem>>, vector<8x32xf32>,
    } else {
    }
    %c0 = arith.constant 0 : index
    %c0_1 = arith.constant 0 : index
    %c0_2 = arith.constant 0 : index
    %3 = vector.load %arg5[%c0, %c0_1, %c0_2] : memref<1x1x8xf32, #tpu.memory_space<vmem>>, vector<1x1x8xf32>
    %4 = vector.shape_cast %3 : vector<1x1x8xf32> to vector<1x8xf32>
    %c0_3 = arith.constant 0 : index
    %c0_4 = arith.constant 0 : index
    %c0_5 = arith.constant 0 : index
    %5 = vector.load %arg3[%c0_3, %c0_4, %c0_5] : memref<1x8x32xbf16, #tpu.memory_space<vmem>>, vector<1x8x8xbf16>
    %6 = vector.shape_cast %5 : vector<1x8x8xbf16> to vector<8x8xbf16>
    %c0_6 = arith.constant 0 : index
    %c0_7 = arith.constant 0 : index
    %c0_8 = arith.constant 0 : index
    %7 = vector.load %arg4[%c0_6, %c0_7, %c0_8] : memref<1x8x64xbf16, #tpu.memory_space<vmem>>, vector<1x8x8xbf16>
    %8 = vector.shape_cast %7 : vector<1x8x8xbf16> to vector<8x8xbf16>
    %c0_9 = arith.constant 0 : index
    %c0_10 = arith.constant 0 : index
    %c32 = arith.constant 32 : index
    %9 = vector.load %arg4[%c0_9, %c0_10, %c32] : memref<1x8x64xbf16, #tpu.memory_space<vmem>>, vector<1x8x8xbf16>
    %10 = vector.shape_cast %9 : vector<1x8x8xbf16> to vector<8x8xbf16>
    %cst = arith.constant dense<0.000000e+00> : vector<8x8xf32>
    %11 = tpu.matmul %6, %8, %cst {dimension_numbers = #tpu.dot_dimension_numbers<[1], [1], [0], [0], [0, 0, 1, 0], [], []>} : vector<8x8xbf16>, vector<8x8xbf16>, vector<8x8xf32> -> vector<8x8xf32>
    %12 = vector.broadcast %4 : vector<1x8xf32> to vector<8x8xf32>
    %13 = arith.addf %11, %12 : vector<8x8xf32>
    %c0_11 = arith.constant 0 : index
    %c0_12 = arith.constant 0 : index
    %14 = vector.load %arg7[%c0_11, %c0_12] : memref<8x4xf32, #tpu.memory_space<vmem>>, vector<8x1xf32>
    %cst_13 = arith.constant dense<0xFF800000> : vector<8xf32>
    %15 = vector.multi_reduction <maximumf>, %13, %cst_13 [1] : vector<8x8xf32> to vector<8xf32>
    %16 = vector.shape_cast %15 : vector<8xf32> to vector<8x1xf32>
    %17 = arith.maximumf %14, %16 : vector<8x1xf32>
    %18 = arith.subf %14, %17 : vector<8x1xf32>
    %19 = math.exp %18 : vector<8x1xf32>
    %20 = vector.broadcast %17 : vector<8x1xf32> to vector<8x8xf32>
    %21 = arith.subf %13, %20 : vector<8x8xf32>
    %22 = math.exp %21 : vector<8x8xf32>
    %c0_14 = arith.constant 0 : index
    %c0_15 = arith.constant 0 : index
    %23 = vector.load %arg8[%c0_14, %c0_15] : memref<8x4xf32, #tpu.memory_space<vmem>>, vector<8x1xf32>
    %24 = arith.mulf %19, %23 : vector<8x1xf32>
    %cst_16 = arith.constant dense<0.000000e+00> : vector<8xf32>
    %25 = vector.multi_reduction <add>, %22, %cst_16 [1] : vector<8x8xf32> to vector<8xf32>
    %26 = vector.shape_cast %25 : vector<8xf32> to vector<8x1xf32>
    %27 = arith.addf %24, %26 : vector<8x1xf32>
    %c0_17 = arith.constant 0 : index
    %c0_18 = arith.constant 0 : index
    %28 = vector.load %arg8[%c0_17, %c0_18] : memref<8x4xf32, #tpu.memory_space<vmem>>, vector<8x1xf32>
    tpu.vector_store %arg8[%c0_17, %c0_18], %27 {strides = array<i32>} : memref<8x4xf32, #tpu.memory_space<vmem>>, vector<8x1xf32>,
    %c0_19 = arith.constant 0 : index
    %c0_20 = arith.constant 0 : index
    %29 = vector.load %arg9[%c0_19, %c0_20] : memref<8x32xf32, #tpu.memory_space<vmem>>, vector<8x8xf32>
    %30 = vector.broadcast %19 : vector<8x1xf32> to vector<8x8xf32>
    %31 = arith.mulf %30, %29 : vector<8x8xf32>
    %32 = arith.truncf %22 : vector<8x8xf32> to vector<8x8xbf16>
    %cst_21 = arith.constant dense<0.000000e+00> : vector<8x8xf32>
    %33 = tpu.matmul %32, %10, %cst_21 {dimension_numbers = #tpu.dot_dimension_numbers<[1], [0], [0], [1], [0, 0, 1, 1], [], []>} : vector<8x8xbf16>, vector<8x8xbf16>, vector<8x8xf32> -> vector<8x8xf32>
    %34 = arith.addf %31, %33 : vector<8x8xf32>
    %c0_22 = arith.constant 0 : index
    %c0_23 = arith.constant 0 : index
    %35 = vector.load %arg9[%c0_22, %c0_23] : memref<8x32xf32, #tpu.memory_space<vmem>>, vector<8x8xf32>
    tpu.vector_store %arg9[%c0_22, %c0_23], %34 {strides = array<i32>} : memref<8x32xf32, #tpu.memory_space<vmem>>, vector<8x8xf32>,
    %c0_24 = arith.constant 0 : index
    %c0_25 = arith.constant 0 : index
    %36 = vector.load %arg7[%c0_24, %c0_25] : memref<8x4xf32, #tpu.memory_space<vmem>>, vector<8x1xf32>
    tpu.vector_store %arg7[%c0_24, %c0_25], %17 {strides = array<i32>} : memref<8x4xf32, #tpu.memory_space<vmem>>, vector<8x1xf32>,
    %c0_26 = arith.constant 0 : index
    %c0_27 = arith.constant 0 : index
    %c8 = arith.constant 8 : index
    %37 = vector.load %arg3[%c0_26, %c0_27, %c8] : memref<1x8x32xbf16, #tpu.memory_space<vmem>>, vector<1x8x8xbf16>
    %38 = vector.shape_cast %37 : vector<1x8x8xbf16> to vector<8x8xbf16>
    %c0_28 = arith.constant 0 : index
    %c0_29 = arith.constant 0 : index
    %c8_30 = arith.constant 8 : index
    %39 = vector.load %arg4[%c0_28, %c0_29, %c8_30] : memref<1x8x64xbf16, #tpu.memory_space<vmem>>, vector<1x8x8xbf16>
    %40 = vector.shape_cast %39 : vector<1x8x8xbf16> to vector<8x8xbf16>
    %c0_31 = arith.constant 0 : index
    %c0_32 = arith.constant 0 : index
    %c40 = arith.constant 40 : index
    %41 = vector.load %arg4[%c0_31, %c0_32, %c40] : memref<1x8x64xbf16, #tpu.memory_space<vmem>>, vector<1x8x8xbf16>
    %42 = vector.shape_cast %41 : vector<1x8x8xbf16> to vector<8x8xbf16>
    %cst_33 = arith.constant dense<0.000000e+00> : vector<8x8xf32>
    %43 = tpu.matmul %38, %40, %cst_33 {dimension_numbers = #tpu.dot_dimension_numbers<[1], [1], [0], [0], [0, 0, 1, 0], [], []>} : vector<8x8xbf16>, vector<8x8xbf16>, vector<8x8xf32> -> vector<8x8xf32>
    %44 = vector.broadcast %4 : vector<1x8xf32> to vector<8x8xf32>
    %45 = arith.addf %43, %44 : vector<8x8xf32>
    %c0_34 = arith.constant 0 : index
    %c1 = arith.constant 1 : index
    %46 = vector.load %arg7[%c0_34, %c1] : memref<8x4xf32, #tpu.memory_space<vmem>>, vector<8x1xf32>
    %cst_35 = arith.constant dense<0xFF800000> : vector<8xf32>
    %47 = vector.multi_reduction <maximumf>, %45, %cst_35 [1] : vector<8x8xf32> to vector<8xf32>
    %48 = vector.shape_cast %47 : vector<8xf32> to vector<8x1xf32>
    %49 = arith.maximumf %46, %48 : vector<8x1xf32>
    %50 = arith.subf %46, %49 : vector<8x1xf32>
    %51 = math.exp %50 : vector<8x1xf32>
    %52 = vector.broadcast %49 : vector<8x1xf32> to vector<8x8xf32>
    %53 = arith.subf %45, %52 : vector<8x8xf32>
    %54 = math.exp %53 : vector<8x8xf32>
    %c0_36 = arith.constant 0 : index
    %c1_37 = arith.constant 1 : index
    %55 = vector.load %arg8[%c0_36, %c1_37] : memref<8x4xf32, #tpu.memory_space<vmem>>, vector<8x1xf32>
    %56 = arith.mulf %51, %55 : vector<8x1xf32>
    %cst_38 = arith.constant dense<0.000000e+00> : vector<8xf32>
    %57 = vector.multi_reduction <add>, %54, %cst_38 [1] : vector<8x8xf32> to vector<8xf32>
    %58 = vector.shape_cast %57 : vector<8xf32> to vector<8x1xf32>
    %59 = arith.addf %56, %58 : vector<8x1xf32>
    %c0_39 = arith.constant 0 : index
    %c1_40 = arith.constant 1 : index
    %60 = vector.load %arg8[%c0_39, %c1_40] : memref<8x4xf32, #tpu.memory_space<vmem>>, vector<8x1xf32>
    tpu.vector_store %arg8[%c0_39, %c1_40], %59 {strides = array<i32>} : memref<8x4xf32, #tpu.memory_space<vmem>>, vector<8x1xf32>,
    %c0_41 = arith.constant 0 : index
    %c8_42 = arith.constant 8 : index
    %61 = vector.load %arg9[%c0_41, %c8_42] : memref<8x32xf32, #tpu.memory_space<vmem>>, vector<8x8xf32>
    %62 = vector.broadcast %51 : vector<8x1xf32> to vector<8x8xf32>
    %63 = arith.mulf %62, %61 : vector<8x8xf32>
    %64 = arith.truncf %54 : vector<8x8xf32> to vector<8x8xbf16>
    %cst_43 = arith.constant dense<0.000000e+00> : vector<8x8xf32>
    %65 = tpu.matmul %64, %42, %cst_43 {dimension_numbers = #tpu.dot_dimension_numbers<[1], [0], [0], [1], [0, 0, 1, 1], [], []>} : vector<8x8xbf16>, vector<8x8xbf16>, vector<8x8xf32> -> vector<8x8xf32>
    %66 = arith.addf %63, %65 : vector<8x8xf32>
    %c0_44 = arith.constant 0 : index
    %c8_45 = arith.constant 8 : index
    %67 = vector.load %arg9[%c0_44, %c8_45] : memref<8x32xf32, #tpu.memory_space<vmem>>, vector<8x8xf32>
    tpu.vector_store %arg9[%c0_44, %c8_45], %66 {strides = array<i32>} : memref<8x32xf32, #tpu.memory_space<vmem>>, vector<8x8xf32>,
    %c0_46 = arith.constant 0 : index
    %c1_47 = arith.constant 1 : index
    %68 = vector.load %arg7[%c0_46, %c1_47] : memref<8x4xf32, #tpu.memory_space<vmem>>, vector<8x1xf32>
    tpu.vector_store %arg7[%c0_46, %c1_47], %49 {strides = array<i32>} : memref<8x4xf32, #tpu.memory_space<vmem>>, vector<8x1xf32>,
    %c0_48 = arith.constant 0 : index
    %c0_49 = arith.constant 0 : index
    %c16 = arith.constant 16 : index
    %69 = vector.load %arg3[%c0_48, %c0_49, %c16] : memref<1x8x32xbf16, #tpu.memory_space<vmem>>, vector<1x8x8xbf16>
    %70 = vector.shape_cast %69 : vector<1x8x8xbf16> to vector<8x8xbf16>
    %c0_50 = arith.constant 0 : index
    %c0_51 = arith.constant 0 : index
    %c16_52 = arith.constant 16 : index
    %71 = vector.load %arg4[%c0_50, %c0_51, %c16_52] : memref<1x8x64xbf16, #tpu.memory_space<vmem>>, vector<1x8x8xbf16>
    %72 = vector.shape_cast %71 : vector<1x8x8xbf16> to vector<8x8xbf16>
    %c0_53 = arith.constant 0 : index
    %c0_54 = arith.constant 0 : index
    %c48 = arith.constant 48 : index
    %73 = vector.load %arg4[%c0_53, %c0_54, %c48] : memref<1x8x64xbf16, #tpu.memory_space<vmem>>, vector<1x8x8xbf16>
    %74 = vector.shape_cast %73 : vector<1x8x8xbf16> to vector<8x8xbf16>
    %cst_55 = arith.constant dense<0.000000e+00> : vector<8x8xf32>
    %75 = tpu.matmul %70, %72, %cst_55 {dimension_numbers = #tpu.dot_dimension_numbers<[1], [1], [0], [0], [0, 0, 1, 0], [], []>} : vector<8x8xbf16>, vector<8x8xbf16>, vector<8x8xf32> -> vector<8x8xf32>
    %76 = vector.broadcast %4 : vector<1x8xf32> to vector<8x8xf32>
    %77 = arith.addf %75, %76 : vector<8x8xf32>
    %c0_56 = arith.constant 0 : index
    %c2 = arith.constant 2 : index
    %78 = vector.load %arg7[%c0_56, %c2] : memref<8x4xf32, #tpu.memory_space<vmem>>, vector<8x1xf32>
    %cst_57 = arith.constant dense<0xFF800000> : vector<8xf32>
    %79 = vector.multi_reduction <maximumf>, %77, %cst_57 [1] : vector<8x8xf32> to vector<8xf32>
    %80 = vector.shape_cast %79 : vector<8xf32> to vector<8x1xf32>
    %81 = arith.maximumf %78, %80 : vector<8x1xf32>
    %82 = arith.subf %78, %81 : vector<8x1xf32>
    %83 = math.exp %82 : vector<8x1xf32>
    %84 = vector.broadcast %81 : vector<8x1xf32> to vector<8x8xf32>
    %85 = arith.subf %77, %84 : vector<8x8xf32>
    %86 = math.exp %85 : vector<8x8xf32>
    %c0_58 = arith.constant 0 : index
    %c2_59 = arith.constant 2 : index
    %87 = vector.load %arg8[%c0_58, %c2_59] : memref<8x4xf32, #tpu.memory_space<vmem>>, vector<8x1xf32>
    %88 = arith.mulf %83, %87 : vector<8x1xf32>
    %cst_60 = arith.constant dense<0.000000e+00> : vector<8xf32>
    %89 = vector.multi_reduction <add>, %86, %cst_60 [1] : vector<8x8xf32> to vector<8xf32>
    %90 = vector.shape_cast %89 : vector<8xf32> to vector<8x1xf32>
    %91 = arith.addf %88, %90 : vector<8x1xf32>
    %c0_61 = arith.constant 0 : index
    %c2_62 = arith.constant 2 : index
    %92 = vector.load %arg8[%c0_61, %c2_62] : memref<8x4xf32, #tpu.memory_space<vmem>>, vector<8x1xf32>
    tpu.vector_store %arg8[%c0_61, %c2_62], %91 {strides = array<i32>} : memref<8x4xf32, #tpu.memory_space<vmem>>, vector<8x1xf32>,
    %c0_63 = arith.constant 0 : index
    %c16_64 = arith.constant 16 : index
    %93 = vector.load %arg9[%c0_63, %c16_64] : memref<8x32xf32, #tpu.memory_space<vmem>>, vector<8x8xf32>
    %94 = vector.broadcast %83 : vector<8x1xf32> to vector<8x8xf32>
    %95 = arith.mulf %94, %93 : vector<8x8xf32>
    %96 = arith.truncf %86 : vector<8x8xf32> to vector<8x8xbf16>
    %cst_65 = arith.constant dense<0.000000e+00> : vector<8x8xf32>
    %97 = tpu.matmul %96, %74, %cst_65 {dimension_numbers = #tpu.dot_dimension_numbers<[1], [0], [0], [1], [0, 0, 1, 1], [], []>} : vector<8x8xbf16>, vector<8x8xbf16>, vector<8x8xf32> -> vector<8x8xf32>
    %98 = arith.addf %95, %97 : vector<8x8xf32>
    %c0_66 = arith.constant 0 : index
    %c16_67 = arith.constant 16 : index
    %99 = vector.load %arg9[%c0_66, %c16_67] : memref<8x32xf32, #tpu.memory_space<vmem>>, vector<8x8xf32>
    tpu.vector_store %arg9[%c0_66, %c16_67], %98 {strides = array<i32>} : memref<8x32xf32, #tpu.memory_space<vmem>>, vector<8x8xf32>,
    %c0_68 = arith.constant 0 : index
    %c2_69 = arith.constant 2 : index
    %100 = vector.load %arg7[%c0_68, %c2_69] : memref<8x4xf32, #tpu.memory_space<vmem>>, vector<8x1xf32>
    tpu.vector_store %arg7[%c0_68, %c2_69], %81 {strides = array<i32>} : memref<8x4xf32, #tpu.memory_space<vmem>>, vector<8x1xf32>,
    %c0_70 = arith.constant 0 : index
    %c0_71 = arith.constant 0 : index
    %c24 = arith.constant 24 : index
    %101 = vector.load %arg3[%c0_70, %c0_71, %c24] : memref<1x8x32xbf16, #tpu.memory_space<vmem>>, vector<1x8x8xbf16>
    %102 = vector.shape_cast %101 : vector<1x8x8xbf16> to vector<8x8xbf16>
    %c0_72 = arith.constant 0 : index
    %c0_73 = arith.constant 0 : index
    %c24_74 = arith.constant 24 : index
    %103 = vector.load %arg4[%c0_72, %c0_73, %c24_74] : memref<1x8x64xbf16, #tpu.memory_space<vmem>>, vector<1x8x8xbf16>
    %104 = vector.shape_cast %103 : vector<1x8x8xbf16> to vector<8x8xbf16>
    %c0_75 = arith.constant 0 : index
    %c0_76 = arith.constant 0 : index
    %c56 = arith.constant 56 : index
    %105 = vector.load %arg4[%c0_75, %c0_76, %c56] : memref<1x8x64xbf16, #tpu.memory_space<vmem>>, vector<1x8x8xbf16>
    %106 = vector.shape_cast %105 : vector<1x8x8xbf16> to vector<8x8xbf16>
    %cst_77 = arith.constant dense<0.000000e+00> : vector<8x8xf32>
    %107 = tpu.matmul %102, %104, %cst_77 {dimension_numbers = #tpu.dot_dimension_numbers<[1], [1], [0], [0], [0, 0, 1, 0], [], []>} : vector<8x8xbf16>, vector<8x8xbf16>, vector<8x8xf32> -> vector<8x8xf32>
    %108 = vector.broadcast %4 : vector<1x8xf32> to vector<8x8xf32>
    %109 = arith.addf %107, %108 : vector<8x8xf32>
    %c0_78 = arith.constant 0 : index
    %c3 = arith.constant 3 : index
    %110 = vector.load %arg7[%c0_78, %c3] : memref<8x4xf32, #tpu.memory_space<vmem>>, vector<8x1xf32>
    %cst_79 = arith.constant dense<0xFF800000> : vector<8xf32>
    %111 = vector.multi_reduction <maximumf>, %109, %cst_79 [1] : vector<8x8xf32> to vector<8xf32>
    %112 = vector.shape_cast %111 : vector<8xf32> to vector<8x1xf32>
    %113 = arith.maximumf %110, %112 : vector<8x1xf32>
    %114 = arith.subf %110, %113 : vector<8x1xf32>
    %115 = math.exp %114 : vector<8x1xf32>
    %116 = vector.broadcast %113 : vector<8x1xf32> to vector<8x8xf32>
    %117 = arith.subf %109, %116 : vector<8x8xf32>
    %118 = math.exp %117 : vector<8x8xf32>
    %c0_80 = arith.constant 0 : index
    %c3_81 = arith.constant 3 : index
    %119 = vector.load %arg8[%c0_80, %c3_81] : memref<8x4xf32, #tpu.memory_space<vmem>>, vector<8x1xf32>
    %120 = arith.mulf %115, %119 : vector<8x1xf32>
    %cst_82 = arith.constant dense<0.000000e+00> : vector<8xf32>
    %121 = vector.multi_reduction <add>, %118, %cst_82 [1] : vector<8x8xf32> to vector<8xf32>
    %122 = vector.shape_cast %121 : vector<8xf32> to vector<8x1xf32>
    %123 = arith.addf %120, %122 : vector<8x1xf32>
    %c0_83 = arith.constant 0 : index
    %c3_84 = arith.constant 3 : index
    %124 = vector.load %arg8[%c0_83, %c3_84] : memref<8x4xf32, #tpu.memory_space<vmem>>, vector<8x1xf32>
    tpu.vector_store %arg8[%c0_83, %c3_84], %123 {strides = array<i32>} : memref<8x4xf32, #tpu.memory_space<vmem>>, vector<8x1xf32>,
    %c0_85 = arith.constant 0 : index
    %c24_86 = arith.constant 24 : index
    %125 = vector.load %arg9[%c0_85, %c24_86] : memref<8x32xf32, #tpu.memory_space<vmem>>, vector<8x8xf32>
    %126 = vector.broadcast %115 : vector<8x1xf32> to vector<8x8xf32>
    %127 = arith.mulf %126, %125 : vector<8x8xf32>
    %128 = arith.truncf %118 : vector<8x8xf32> to vector<8x8xbf16>
    %cst_87 = arith.constant dense<0.000000e+00> : vector<8x8xf32>
    %129 = tpu.matmul %128, %106, %cst_87 {dimension_numbers = #tpu.dot_dimension_numbers<[1], [0], [0], [1], [0, 0, 1, 1], [], []>} : vector<8x8xbf16>, vector<8x8xbf16>, vector<8x8xf32> -> vector<8x8xf32>
    %130 = arith.addf %127, %129 : vector<8x8xf32>
    %c0_88 = arith.constant 0 : index
    %c24_89 = arith.constant 24 : index
    %131 = vector.load %arg9[%c0_88, %c24_89] : memref<8x32xf32, #tpu.memory_space<vmem>>, vector<8x8xf32>
    tpu.vector_store %arg9[%c0_88, %c24_89], %130 {strides = array<i32>} : memref<8x32xf32, #tpu.memory_space<vmem>>, vector<8x8xf32>,
    %c0_90 = arith.constant 0 : index
    %c3_91 = arith.constant 3 : index
    %132 = vector.load %arg7[%c0_90, %c3_91] : memref<8x4xf32, #tpu.memory_space<vmem>>, vector<8x1xf32>
    tpu.vector_store %arg7[%c0_90, %c3_91], %113 {strides = array<i32>} : memref<8x4xf32, #tpu.memory_space<vmem>>, vector<8x1xf32>,
    %c0_i32_92 = arith.constant 0 : i32
    %133 = arith.cmpi eq, %arg2, %c0_i32_92 : i32
    %134 = arith.extui %133 : i1 to i32
    %c0_i32_93 = arith.constant 0 : i32
    %135 = arith.cmpi ne, %134, %c0_i32_93 : i32
    scf.if %135 {
      %c0_94 = arith.constant 0 : index
      %c0_95 = arith.constant 0 : index
      %136 = vector.load %arg8[%c0_94, %c0_95] : memref<8x4xf32, #tpu.memory_space<vmem>>, vector<8x1xf32>
      %137 = tpu.reciprocal %136 {approx = true} : vector<8x1xf32> -> vector<8x1xf32>
      %c0_96 = arith.constant 0 : index
      %c0_97 = arith.constant 0 : index
      %138 = vector.load %arg9[%c0_96, %c0_97] : memref<8x32xf32, #tpu.memory_space<vmem>>, vector<8x8xf32>
      %139 = vector.broadcast %137 : vector<8x1xf32> to vector<8x8xf32>
      %140 = arith.mulf %138, %139 : vector<8x8xf32>
      %c0_98 = arith.constant 0 : index
      %c0_99 = arith.constant 0 : index
      %141 = vector.load %arg9[%c0_98, %c0_99] : memref<8x32xf32, #tpu.memory_space<vmem>>, vector<8x8xf32>
      tpu.vector_store %arg9[%c0_98, %c0_99], %140 {strides = array<i32>} : memref<8x32xf32, #tpu.memory_space<vmem>>, vector<8x8xf32>,
      %c0_100 = arith.constant 0 : index
      %c1_101 = arith.constant 1 : index
      %142 = vector.load %arg8[%c0_100, %c1_101] : memref<8x4xf32, #tpu.memory_space<vmem>>, vector<8x1xf32>
      %143 = tpu.reciprocal %142 {approx = true} : vector<8x1xf32> -> vector<8x1xf32>
      %c0_102 = arith.constant 0 : index
      %c8_103 = arith.constant 8 : index
      %144 = vector.load %arg9[%c0_102, %c8_103] : memref<8x32xf32, #tpu.memory_space<vmem>>, vector<8x8xf32>
      %145 = vector.broadcast %143 : vector<8x1xf32> to vector<8x8xf32>
      %146 = arith.mulf %144, %145 : vector<8x8xf32>
      %c0_104 = arith.constant 0 : index
      %c8_105 = arith.constant 8 : index
      %147 = vector.load %arg9[%c0_104, %c8_105] : memref<8x32xf32, #tpu.memory_space<vmem>>, vector<8x8xf32>
      tpu.vector_store %arg9[%c0_104, %c8_105], %146 {strides = array<i32>} : memref<8x32xf32, #tpu.memory_space<vmem>>, vector<8x8xf32>,
      %c0_106 = arith.constant 0 : index
      %c2_107 = arith.constant 2 : index
      %148 = vector.load %arg8[%c0_106, %c2_107] : memref<8x4xf32, #tpu.memory_space<vmem>>, vector<8x1xf32>
      %149 = tpu.reciprocal %148 {approx = true} : vector<8x1xf32> -> vector<8x1xf32>
      %c0_108 = arith.constant 0 : index
      %c16_109 = arith.constant 16 : index
      %150 = vector.load %arg9[%c0_108, %c16_109] : memref<8x32xf32, #tpu.memory_space<vmem>>, vector<8x8xf32>
      %151 = vector.broadcast %149 : vector<8x1xf32> to vector<8x8xf32>
      %152 = arith.mulf %150, %151 : vector<8x8xf32>
      %c0_110 = arith.constant 0 : index
      %c16_111 = arith.constant 16 : index
      %153 = vector.load %arg9[%c0_110, %c16_111] : memref<8x32xf32, #tpu.memory_space<vmem>>, vector<8x8xf32>
      tpu.vector_store %arg9[%c0_110, %c16_111], %152 {strides = array<i32>} : memref<8x32xf32, #tpu.memory_space<vmem>>, vector<8x8xf32>,
      %c0_112 = arith.constant 0 : index
      %c3_113 = arith.constant 3 : index
      %154 = vector.load %arg8[%c0_112, %c3_113] : memref<8x4xf32, #tpu.memory_space<vmem>>, vector<8x1xf32>
      %155 = tpu.reciprocal %154 {approx = true} : vector<8x1xf32> -> vector<8x1xf32>
      %c0_114 = arith.constant 0 : index
      %c24_115 = arith.constant 24 : index
      %156 = vector.load %arg9[%c0_114, %c24_115] : memref<8x32xf32, #tpu.memory_space<vmem>>, vector<8x8xf32>
      %157 = vector.broadcast %155 : vector<8x1xf32> to vector<8x8xf32>
      %158 = arith.mulf %156, %157 : vector<8x8xf32>
      %c0_116 = arith.constant 0 : index
      %c24_117 = arith.constant 24 : index
      %159 = vector.load %arg9[%c0_116, %c24_117] : memref<8x32xf32, #tpu.memory_space<vmem>>, vector<8x8xf32>
      tpu.vector_store %arg9[%c0_116, %c24_117], %158 {strides = array<i32>} : memref<8x32xf32, #tpu.memory_space<vmem>>, vector<8x8xf32>,
      %c0_118 = arith.constant 0 : index
      %c0_119 = arith.constant 0 : index
      %160 = vector.load %arg9[%c0_118, %c0_119] : memref<8x32xf32, #tpu.memory_space<vmem>>, vector<8x32xf32>
      %161 = arith.truncf %160 : vector<8x32xf32> to vector<8x32xbf16>
      %c0_120 = arith.constant 0 : index
      %c0_121 = arith.constant 0 : index
      %c0_122 = arith.constant 0 : index
      %162 = vector.load %arg6[%c0_120, %c0_121, %c0_122] : memref<1x8x32xbf16, #tpu.memory_space<vmem>>, vector<1x8x32xbf16>
      %163 = vector.shape_cast %162 : vector<1x8x32xbf16> to vector<8x32xbf16>
      %164 = vector.shape_cast %161 : vector<8x32xbf16> to vector<1x8x32xbf16>
      tpu.vector_store %arg6[%c0_120, %c0_121, %c0_122], %164 {strides = array<i32>} : memref<1x8x32xbf16, #tpu.memory_space<vmem>>, vector<1x8x32xbf16>,
    } else {
    }
    return
  }
  func.func @transform_0(%arg0: i32, %arg1: i32, %arg2: i32) -> (i32, i32, i32) {
    %c0_i32 = arith.constant 0 : i32
    %c0_i32_0 = arith.constant 0 : i32
    return %arg0, %arg1, %c0_i32 : i32, i32, i32
  }
  func.func @transform_1(%arg0: i32, %arg1: i32, %arg2: i32) -> (i32, i32, i32) {
    %c0_i32 = arith.constant 0 : i32
    %c0_i32_0 = arith.constant 0 : i32
    return %arg0, %arg2, %c0_i32 : i32, i32, i32
  }
  func.func @transform_2(%arg0: i32, %arg1: i32, %arg2: i32) -> (i32, i32, i32) {
    %c0_i32 = arith.constant 0 : i32
    %c0_i32_0 = arith.constant 0 : i32
    return %arg0, %c0_i32, %arg2 : i32, i32, i32
  }
  func.func @transform_3(%arg0: i32, %arg1: i32, %arg2: i32) -> (i32, i32, i32) {
    %c0_i32 = arith.constant 0 : i32
    %c0_i32_0 = arith.constant 0 : i32
    return %arg0, %arg1, %c0_i32 : i32, i32, i32
  }
}

module attributes {stable_mosaic.version = 11 : i64} {
  func.func @_ln_qkv_kernel(%arg0: i32, %arg1: i32, %arg2: memref<16x32xf32, #tpu.memory_space<vmem>>, %arg3: memref<1x32xf32, #tpu.memory_space<vmem>>, %arg4: memref<1x32xf32, #tpu.memory_space<vmem>>, %arg5: memref<32x96xbf16, #tpu.memory_space<vmem>>, %arg6: memref<1x96xf32, #tpu.memory_space<vmem>>, %arg7: memref<16x96xbf16, #tpu.memory_space<vmem>>, %arg8: memref<16x32xbf16, #tpu.memory_space<vmem>>) attributes {dimension_semantics = [#tpu.dimension_semantics<parallel>, #tpu.dimension_semantics<arbitrary>], iteration_bounds = array<i64: 1, 1>, scalar_prefetch = 0 : i64, scratch_operands = 1 : i64, tpu.core_type = #tpu.core_type<tc>, window_params = [{transform_indices = @transform_0, window_bounds = array<i64: 16, 32>}, {pipeline_mode = #tpu.pipeline_mode<synchronous>, transform_indices = @transform_1, window_bounds = array<i64: 1, 32>}, {pipeline_mode = #tpu.pipeline_mode<synchronous>, transform_indices = @transform_2, window_bounds = array<i64: 1, 32>}, {transform_indices = @transform_3, window_bounds = array<i64: 32, 96>}, {transform_indices = @transform_4, window_bounds = array<i64: 1, 96>}, {transform_indices = @transform_5, window_bounds = array<i64: 16, 96>}]} {
    %c0_i32 = arith.constant 0 : i32
    %0 = arith.cmpi eq, %arg1, %c0_i32 : i32
    %1 = arith.extui %0 : i1 to i32
    %c0_i32_0 = arith.constant 0 : i32
    %2 = arith.cmpi ne, %1, %c0_i32_0 : i32
    scf.if %2 {
      %c0_8 = arith.constant 0 : index
      %c0_9 = arith.constant 0 : index
      %11 = vector.load %arg2[%c0_8, %c0_9] : memref<16x32xf32, #tpu.memory_space<vmem>>, vector<16x32xf32>
      %cst_10 = arith.constant dense<0.000000e+00> : vector<16xf32>
      %12 = vector.multi_reduction <add>, %11, %cst_10 [1] : vector<16x32xf32> to vector<16xf32>
      %13 = vector.shape_cast %12 : vector<16xf32> to vector<16x1xf32>
      %cst_11 = arith.constant 3.200000e+01 : f32
      %14 = vector.broadcast %cst_11 : f32 to vector<16x1xf32>
      %15 = arith.divf %13, %14 : vector<16x1xf32>
      %16 = vector.broadcast %15 : vector<16x1xf32> to vector<16x32xf32>
      %17 = arith.subf %11, %16 : vector<16x32xf32>
      %18 = arith.mulf %17, %17 : vector<16x32xf32>
      %cst_12 = arith.constant dense<0.000000e+00> : vector<16xf32>
      %19 = vector.multi_reduction <add>, %18, %cst_12 [1] : vector<16x32xf32> to vector<16xf32>
      %20 = vector.shape_cast %19 : vector<16xf32> to vector<16x1xf32>
      %cst_13 = arith.constant 3.200000e+01 : f32
      %21 = vector.broadcast %cst_13 : f32 to vector<16x1xf32>
      %22 = arith.divf %20, %21 : vector<16x1xf32>
      %23 = vector.broadcast %15 : vector<16x1xf32> to vector<16x32xf32>
      %24 = arith.subf %11, %23 : vector<16x32xf32>
      %cst_14 = arith.constant 9.99999974E-6 : f32
      %25 = vector.broadcast %cst_14 : f32 to vector<16x1xf32>
      %26 = arith.addf %22, %25 : vector<16x1xf32>
      %27 = math.rsqrt %26 : vector<16x1xf32>
      %28 = vector.broadcast %27 : vector<16x1xf32> to vector<16x32xf32>
      %29 = arith.mulf %24, %28 : vector<16x32xf32>
      %c0_15 = arith.constant 0 : index
      %c0_16 = arith.constant 0 : index
      %30 = vector.load %arg3[%c0_15, %c0_16] : memref<1x32xf32, #tpu.memory_space<vmem>>, vector<1x32xf32>
      %31 = vector.broadcast %30 : vector<1x32xf32> to vector<16x32xf32>
      %32 = arith.mulf %29, %31 : vector<16x32xf32>
      %c0_17 = arith.constant 0 : index
      %c0_18 = arith.constant 0 : index
      %33 = vector.load %arg4[%c0_17, %c0_18] : memref<1x32xf32, #tpu.memory_space<vmem>>, vector<1x32xf32>
      %34 = vector.broadcast %33 : vector<1x32xf32> to vector<16x32xf32>
      %35 = arith.addf %32, %34 : vector<16x32xf32>
      %36 = arith.truncf %35 : vector<16x32xf32> to vector<16x32xbf16>
      %c0_19 = arith.constant 0 : index
      %c0_20 = arith.constant 0 : index
      %37 = vector.load %arg8[%c0_19, %c0_20] : memref<16x32xbf16, #tpu.memory_space<vmem>>, vector<16x32xbf16>
      tpu.vector_store %arg8[%c0_19, %c0_20], %36 {strides = array<i32>} : memref<16x32xbf16, #tpu.memory_space<vmem>>, vector<16x32xbf16>,
    } else {
    }
    %c0 = arith.constant 0 : index
    %c0_1 = arith.constant 0 : index
    %3 = vector.load %arg8[%c0, %c0_1] : memref<16x32xbf16, #tpu.memory_space<vmem>>, vector<16x32xbf16>
    %c0_2 = arith.constant 0 : index
    %c0_3 = arith.constant 0 : index
    %4 = vector.load %arg5[%c0_2, %c0_3] : memref<32x96xbf16, #tpu.memory_space<vmem>>, vector<32x96xbf16>
    %cst = arith.constant dense<0.000000e+00> : vector<16x96xf32>
    %5 = tpu.matmul %3, %4, %cst {dimension_numbers = #tpu.dot_dimension_numbers<[1], [0], [0], [1], [0, 0, 1, 1], [], []>} : vector<16x32xbf16>, vector<32x96xbf16>, vector<16x96xf32> -> vector<16x96xf32>
    %c0_4 = arith.constant 0 : index
    %c0_5 = arith.constant 0 : index
    %6 = vector.load %arg6[%c0_4, %c0_5] : memref<1x96xf32, #tpu.memory_space<vmem>>, vector<1x96xf32>
    %7 = vector.broadcast %6 : vector<1x96xf32> to vector<16x96xf32>
    %8 = arith.addf %5, %7 : vector<16x96xf32>
    %9 = arith.truncf %8 : vector<16x96xf32> to vector<16x96xbf16>
    %c0_6 = arith.constant 0 : index
    %c0_7 = arith.constant 0 : index
    %10 = vector.load %arg7[%c0_6, %c0_7] : memref<16x96xbf16, #tpu.memory_space<vmem>>, vector<16x96xbf16>
    tpu.vector_store %arg7[%c0_6, %c0_7], %9 {strides = array<i32>} : memref<16x96xbf16, #tpu.memory_space<vmem>>, vector<16x96xbf16>,
    return
  }
  func.func @transform_0(%arg0: i32, %arg1: i32) -> (i32, i32) {
    %c0_i32 = arith.constant 0 : i32
    %c0_i32_0 = arith.constant 0 : i32
    return %arg0, %c0_i32 : i32, i32
  }
  func.func @transform_1(%arg0: i32, %arg1: i32) -> (i32, i32) {
    %c0_i32 = arith.constant 0 : i32
    %c0_i32_0 = arith.constant 0 : i32
    %c0_i32_1 = arith.constant 0 : i32
    return %c0_i32, %c0_i32_0 : i32, i32
  }
  func.func @transform_2(%arg0: i32, %arg1: i32) -> (i32, i32) {
    %c0_i32 = arith.constant 0 : i32
    %c0_i32_0 = arith.constant 0 : i32
    %c0_i32_1 = arith.constant 0 : i32
    return %c0_i32, %c0_i32_0 : i32, i32
  }
  func.func @transform_3(%arg0: i32, %arg1: i32) -> (i32, i32) {
    %c0_i32 = arith.constant 0 : i32
    %c0_i32_0 = arith.constant 0 : i32
    return %c0_i32, %arg1 : i32, i32
  }
  func.func @transform_4(%arg0: i32, %arg1: i32) -> (i32, i32) {
    %c0_i32 = arith.constant 0 : i32
    %c0_i32_0 = arith.constant 0 : i32
    return %c0_i32, %arg1 : i32, i32
  }
  func.func @transform_5(%arg0: i32, %arg1: i32) -> (i32, i32) {
    %c0_i32 = arith.constant 0 : i32
    return %arg0, %arg1 : i32, i32
  }
}

module attributes {stable_mosaic.version = 11 : i64} {
  func.func @_linear_gelu_kernel(%arg0: i32, %arg1: i32, %arg2: memref<16x32xbf16, #tpu.memory_space<vmem>>, %arg3: memref<32x64xbf16, #tpu.memory_space<vmem>>, %arg4: memref<1x64xf32, #tpu.memory_space<vmem>>, %arg5: memref<16x64xbf16, #tpu.memory_space<vmem>>) attributes {dimension_semantics = [#tpu.dimension_semantics<parallel>, #tpu.dimension_semantics<parallel>], iteration_bounds = array<i64: 1, 1>, scalar_prefetch = 0 : i64, scratch_operands = 0 : i64, tpu.core_type = #tpu.core_type<tc>, window_params = [{transform_indices = @transform_0, window_bounds = array<i64: 16, 32>}, {transform_indices = @transform_1, window_bounds = array<i64: 32, 64>}, {transform_indices = @transform_2, window_bounds = array<i64: 1, 64>}, {transform_indices = @transform_3, window_bounds = array<i64: 16, 64>}]} {
    %c0 = arith.constant 0 : index
    %c0_0 = arith.constant 0 : index
    %0 = vector.load %arg2[%c0, %c0_0] : memref<16x32xbf16, #tpu.memory_space<vmem>>, vector<16x32xbf16>
    %c0_1 = arith.constant 0 : index
    %c0_2 = arith.constant 0 : index
    %1 = vector.load %arg3[%c0_1, %c0_2] : memref<32x64xbf16, #tpu.memory_space<vmem>>, vector<32x64xbf16>
    %cst = arith.constant dense<0.000000e+00> : vector<16x64xf32>
    %2 = tpu.matmul %0, %1, %cst {dimension_numbers = #tpu.dot_dimension_numbers<[1], [0], [0], [1], [0, 0, 1, 1], [], []>} : vector<16x32xbf16>, vector<32x64xbf16>, vector<16x64xf32> -> vector<16x64xf32>
    %c0_3 = arith.constant 0 : index
    %c0_4 = arith.constant 0 : index
    %3 = vector.load %arg4[%c0_3, %c0_4] : memref<1x64xf32, #tpu.memory_space<vmem>>, vector<1x64xf32>
    %4 = vector.broadcast %3 : vector<1x64xf32> to vector<16x64xf32>
    %5 = arith.addf %2, %4 : vector<16x64xf32>
    %6 = arith.mulf %5, %5 : vector<16x64xf32>
    %7 = arith.mulf %5, %6 : vector<16x64xf32>
    %cst_5 = arith.constant 4.471500e-02 : f32
    %8 = vector.broadcast %cst_5 : f32 to vector<16x64xf32>
    %9 = arith.mulf %8, %7 : vector<16x64xf32>
    %10 = arith.addf %5, %9 : vector<16x64xf32>
    %cst_6 = arith.constant 0.797884583 : f32
    %11 = vector.broadcast %cst_6 : f32 to vector<16x64xf32>
    %12 = arith.mulf %11, %10 : vector<16x64xf32>
    %13 = math.tanh %12 : vector<16x64xf32>
    %cst_7 = arith.constant 1.000000e+00 : f32
    %14 = vector.broadcast %cst_7 : f32 to vector<16x64xf32>
    %15 = arith.addf %14, %13 : vector<16x64xf32>
    %cst_8 = arith.constant 5.000000e-01 : f32
    %16 = vector.broadcast %cst_8 : f32 to vector<16x64xf32>
    %17 = arith.mulf %16, %15 : vector<16x64xf32>
    %18 = arith.mulf %5, %17 : vector<16x64xf32>
    %19 = arith.truncf %18 : vector<16x64xf32> to vector<16x64xbf16>
    %c0_9 = arith.constant 0 : index
    %c0_10 = arith.constant 0 : index
    %20 = vector.load %arg5[%c0_9, %c0_10] : memref<16x64xbf16, #tpu.memory_space<vmem>>, vector<16x64xbf16>
    tpu.vector_store %arg5[%c0_9, %c0_10], %19 {strides = array<i32>} : memref<16x64xbf16, #tpu.memory_space<vmem>>, vector<16x64xbf16>,
    return
  }
  func.func @transform_0(%arg0: i32, %arg1: i32) -> (i32, i32) {
    %c0_i32 = arith.constant 0 : i32
    %c0_i32_0 = arith.constant 0 : i32
    return %arg0, %c0_i32 : i32, i32
  }
  func.func @transform_1(%arg0: i32, %arg1: i32) -> (i32, i32) {
    %c0_i32 = arith.constant 0 : i32
    %c0_i32_0 = arith.constant 0 : i32
    return %c0_i32, %arg1 : i32, i32
  }
  func.func @transform_2(%arg0: i32, %arg1: i32) -> (i32, i32) {
    %c0_i32 = arith.constant 0 : i32
    %c0_i32_0 = arith.constant 0 : i32
    return %c0_i32, %arg1 : i32, i32
  }
  func.func @transform_3(%arg0: i32, %arg1: i32) -> (i32, i32) {
    %c0_i32 = arith.constant 0 : i32
    return %arg0, %arg1 : i32, i32
  }
}

module attributes {stable_mosaic.version = 11 : i64} {
  func.func @_out_resid_ln_kernel(%arg0: i32, %arg1: i32, %arg2: memref<16x32xbf16, #tpu.memory_space<vmem>>, %arg3: memref<32x32xbf16, #tpu.memory_space<vmem>>, %arg4: memref<1x32xf32, #tpu.memory_space<vmem>>, %arg5: memref<16x32xf32, #tpu.memory_space<vmem>>, %arg6: memref<1x32xf32, #tpu.memory_space<vmem>>, %arg7: memref<1x32xf32, #tpu.memory_space<vmem>>, %arg8: memref<16x32xf32, #tpu.memory_space<vmem>>, %arg9: memref<16x32xbf16, #tpu.memory_space<vmem>>, %arg10: memref<16x32xf32, #tpu.memory_space<vmem>>) attributes {dimension_semantics = [#tpu.dimension_semantics<parallel>, #tpu.dimension_semantics<arbitrary>], iteration_bounds = array<i64: 1, 1>, scalar_prefetch = 0 : i64, scratch_operands = 1 : i64, tpu.core_type = #tpu.core_type<tc>, window_params = [{transform_indices = @transform_0, window_bounds = array<i64: 16, 32>}, {transform_indices = @transform_1, window_bounds = array<i64: 32, 32>}, {pipeline_mode = #tpu.pipeline_mode<synchronous>, transform_indices = @transform_2, window_bounds = array<i64: 1, 32>}, {transform_indices = @transform_3, window_bounds = array<i64: 16, 32>}, {pipeline_mode = #tpu.pipeline_mode<synchronous>, transform_indices = @transform_4, window_bounds = array<i64: 1, 32>}, {pipeline_mode = #tpu.pipeline_mode<synchronous>, transform_indices = @transform_5, window_bounds = array<i64: 1, 32>}, {transform_indices = @transform_6, window_bounds = array<i64: 16, 32>}, {transform_indices = @transform_7, window_bounds = array<i64: 16, 32>}]} {
    %c0_i32 = arith.constant 0 : i32
    %0 = arith.cmpi eq, %arg1, %c0_i32 : i32
    %1 = arith.extui %0 : i1 to i32
    %c0_i32_0 = arith.constant 0 : i32
    %2 = arith.cmpi ne, %1, %c0_i32_0 : i32
    scf.if %2 {
      %cst_10 = arith.constant 0.000000e+00 : f32
      %12 = vector.broadcast %cst_10 : f32 to vector<16x32xf32>
      %c0_11 = arith.constant 0 : index
      %c0_12 = arith.constant 0 : index
      %13 = vector.load %arg10[%c0_11, %c0_12] : memref<16x32xf32, #tpu.memory_space<vmem>>, vector<16x32xf32>
      tpu.vector_store %arg10[%c0_11, %c0_12], %12 {strides = array<i32>} : memref<16x32xf32, #tpu.memory_space<vmem>>, vector<16x32xf32>,
    } else {
    }
    %c0 = arith.constant 0 : index
    %c0_1 = arith.constant 0 : index
    %3 = vector.load %arg10[%c0, %c0_1] : memref<16x32xf32, #tpu.memory_space<vmem>>, vector<16x32xf32>
    %c0_2 = arith.constant 0 : index
    %c0_3 = arith.constant 0 : index
    %4 = vector.load %arg2[%c0_2, %c0_3] : memref<16x32xbf16, #tpu.memory_space<vmem>>, vector<16x32xbf16>
    %c0_4 = arith.constant 0 : index
    %c0_5 = arith.constant 0 : index
    %5 = vector.load %arg3[%c0_4, %c0_5] : memref<32x32xbf16, #tpu.memory_space<vmem>>, vector<32x32xbf16>
    %cst = arith.constant dense<0.000000e+00> : vector<16x32xf32>
    %6 = tpu.matmul %4, %5, %cst {dimension_numbers = #tpu.dot_dimension_numbers<[1], [0], [0], [1], [0, 0, 1, 1], [], []>} : vector<16x32xbf16>, vector<32x32xbf16>, vector<16x32xf32> -> vector<16x32xf32>
    %7 = arith.addf %3, %6 : vector<16x32xf32>
    %c0_6 = arith.constant 0 : index
    %c0_7 = arith.constant 0 : index
    %8 = vector.load %arg10[%c0_6, %c0_7] : memref<16x32xf32, #tpu.memory_space<vmem>>, vector<16x32xf32>
    tpu.vector_store %arg10[%c0_6, %c0_7], %7 {strides = array<i32>} : memref<16x32xf32, #tpu.memory_space<vmem>>, vector<16x32xf32>,
    %c0_i32_8 = arith.constant 0 : i32
    %9 = arith.cmpi eq, %arg1, %c0_i32_8 : i32
    %10 = arith.extui %9 : i1 to i32
    %c0_i32_9 = arith.constant 0 : i32
    %11 = arith.cmpi ne, %10, %c0_i32_9 : i32
    scf.if %11 {
      %c0_10 = arith.constant 0 : index
      %c0_11 = arith.constant 0 : index
      %12 = vector.load %arg10[%c0_10, %c0_11] : memref<16x32xf32, #tpu.memory_space<vmem>>, vector<16x32xf32>
      %c0_12 = arith.constant 0 : index
      %c0_13 = arith.constant 0 : index
      %13 = vector.load %arg4[%c0_12, %c0_13] : memref<1x32xf32, #tpu.memory_space<vmem>>, vector<1x32xf32>
      %14 = vector.broadcast %13 : vector<1x32xf32> to vector<16x32xf32>
      %15 = arith.addf %12, %14 : vector<16x32xf32>
      %c0_14 = arith.constant 0 : index
      %c0_15 = arith.constant 0 : index
      %16 = vector.load %arg5[%c0_14, %c0_15] : memref<16x32xf32, #tpu.memory_space<vmem>>, vector<16x32xf32>
      %17 = arith.addf %15, %16 : vector<16x32xf32>
      %c0_16 = arith.constant 0 : index
      %c0_17 = arith.constant 0 : index
      %18 = vector.load %arg8[%c0_16, %c0_17] : memref<16x32xf32, #tpu.memory_space<vmem>>, vector<16x32xf32>
      tpu.vector_store %arg8[%c0_16, %c0_17], %17 {strides = array<i32>} : memref<16x32xf32, #tpu.memory_space<vmem>>, vector<16x32xf32>,
      %cst_18 = arith.constant dense<0.000000e+00> : vector<16xf32>
      %19 = vector.multi_reduction <add>, %17, %cst_18 [1] : vector<16x32xf32> to vector<16xf32>
      %20 = vector.shape_cast %19 : vector<16xf32> to vector<16x1xf32>
      %cst_19 = arith.constant 3.200000e+01 : f32
      %21 = vector.broadcast %cst_19 : f32 to vector<16x1xf32>
      %22 = arith.divf %20, %21 : vector<16x1xf32>
      %23 = vector.broadcast %22 : vector<16x1xf32> to vector<16x32xf32>
      %24 = arith.subf %17, %23 : vector<16x32xf32>
      %25 = arith.mulf %24, %24 : vector<16x32xf32>
      %cst_20 = arith.constant dense<0.000000e+00> : vector<16xf32>
      %26 = vector.multi_reduction <add>, %25, %cst_20 [1] : vector<16x32xf32> to vector<16xf32>
      %27 = vector.shape_cast %26 : vector<16xf32> to vector<16x1xf32>
      %cst_21 = arith.constant 3.200000e+01 : f32
      %28 = vector.broadcast %cst_21 : f32 to vector<16x1xf32>
      %29 = arith.divf %27, %28 : vector<16x1xf32>
      %30 = vector.broadcast %22 : vector<16x1xf32> to vector<16x32xf32>
      %31 = arith.subf %17, %30 : vector<16x32xf32>
      %cst_22 = arith.constant 9.99999974E-6 : f32
      %32 = vector.broadcast %cst_22 : f32 to vector<16x1xf32>
      %33 = arith.addf %29, %32 : vector<16x1xf32>
      %34 = math.rsqrt %33 : vector<16x1xf32>
      %35 = vector.broadcast %34 : vector<16x1xf32> to vector<16x32xf32>
      %36 = arith.mulf %31, %35 : vector<16x32xf32>
      %c0_23 = arith.constant 0 : index
      %c0_24 = arith.constant 0 : index
      %37 = vector.load %arg6[%c0_23, %c0_24] : memref<1x32xf32, #tpu.memory_space<vmem>>, vector<1x32xf32>
      %38 = vector.broadcast %37 : vector<1x32xf32> to vector<16x32xf32>
      %39 = arith.mulf %36, %38 : vector<16x32xf32>
      %c0_25 = arith.constant 0 : index
      %c0_26 = arith.constant 0 : index
      %40 = vector.load %arg7[%c0_25, %c0_26] : memref<1x32xf32, #tpu.memory_space<vmem>>, vector<1x32xf32>
      %41 = vector.broadcast %40 : vector<1x32xf32> to vector<16x32xf32>
      %42 = arith.addf %39, %41 : vector<16x32xf32>
      %43 = arith.truncf %42 : vector<16x32xf32> to vector<16x32xbf16>
      %c0_27 = arith.constant 0 : index
      %c0_28 = arith.constant 0 : index
      %44 = vector.load %arg9[%c0_27, %c0_28] : memref<16x32xbf16, #tpu.memory_space<vmem>>, vector<16x32xbf16>
      tpu.vector_store %arg9[%c0_27, %c0_28], %43 {strides = array<i32>} : memref<16x32xbf16, #tpu.memory_space<vmem>>, vector<16x32xbf16>,
    } else {
    }
    return
  }
  func.func @transform_0(%arg0: i32, %arg1: i32) -> (i32, i32) {
    %c0_i32 = arith.constant 0 : i32
    return %arg0, %arg1 : i32, i32
  }
  func.func @transform_1(%arg0: i32, %arg1: i32) -> (i32, i32) {
    %c0_i32 = arith.constant 0 : i32
    %c0_i32_0 = arith.constant 0 : i32
    return %arg1, %c0_i32 : i32, i32
  }
  func.func @transform_2(%arg0: i32, %arg1: i32) -> (i32, i32) {
    %c0_i32 = arith.constant 0 : i32
    %c0_i32_0 = arith.constant 0 : i32
    %c0_i32_1 = arith.constant 0 : i32
    return %c0_i32, %c0_i32_0 : i32, i32
  }
  func.func @transform_3(%arg0: i32, %arg1: i32) -> (i32, i32) {
    %c0_i32 = arith.constant 0 : i32
    %c0_i32_0 = arith.constant 0 : i32
    return %arg0, %c0_i32 : i32, i32
  }
  func.func @transform_4(%arg0: i32, %arg1: i32) -> (i32, i32) {
    %c0_i32 = arith.constant 0 : i32
    %c0_i32_0 = arith.constant 0 : i32
    %c0_i32_1 = arith.constant 0 : i32
    return %c0_i32, %c0_i32_0 : i32, i32
  }
  func.func @transform_5(%arg0: i32, %arg1: i32) -> (i32, i32) {
    %c0_i32 = arith.constant 0 : i32
    %c0_i32_0 = arith.constant 0 : i32
    %c0_i32_1 = arith.constant 0 : i32
    return %c0_i32, %c0_i32_0 : i32, i32
  }
  func.func @transform_6(%arg0: i32, %arg1: i32) -> (i32, i32) {
    %c0_i32 = arith.constant 0 : i32
    %c0_i32_0 = arith.constant 0 : i32
    return %arg0, %c0_i32 : i32, i32
  }
  func.func @transform_7(%arg0: i32, %arg1: i32) -> (i32, i32) {
    %c0_i32 = arith.constant 0 : i32
    %c0_i32_0 = arith.constant 0 : i32
    return %arg0, %c0_i32 : i32, i32
  }
}

module attributes {stable_mosaic.version = 11 : i64} {
  func.func @_ffn2_resid_head_kernel(%arg0: i32, %arg1: i32, %arg2: memref<16x64xbf16, #tpu.memory_space<vmem>>, %arg3: memref<64x32xbf16, #tpu.memory_space<vmem>>, %arg4: memref<1x32xf32, #tpu.memory_space<vmem>>, %arg5: memref<16x32xf32, #tpu.memory_space<vmem>>, %arg6: memref<32x128xbf16, #tpu.memory_space<vmem>>, %arg7: memref<1x128xf32, #tpu.memory_space<vmem>>, %arg8: memref<16x128xf32, #tpu.memory_space<vmem>>, %arg9: memref<16x32xf32, #tpu.memory_space<vmem>>) attributes {dimension_semantics = [#tpu.dimension_semantics<parallel>, #tpu.dimension_semantics<arbitrary>], iteration_bounds = array<i64: 1, 1>, scalar_prefetch = 0 : i64, scratch_operands = 1 : i64, tpu.core_type = #tpu.core_type<tc>, window_params = [{transform_indices = @transform_0, window_bounds = array<i64: 16, 64>}, {transform_indices = @transform_1, window_bounds = array<i64: 64, 32>}, {pipeline_mode = #tpu.pipeline_mode<synchronous>, transform_indices = @transform_2, window_bounds = array<i64: 1, 32>}, {transform_indices = @transform_3, window_bounds = array<i64: 16, 32>}, {pipeline_mode = #tpu.pipeline_mode<synchronous>, transform_indices = @transform_4, window_bounds = array<i64: 32, 128>}, {pipeline_mode = #tpu.pipeline_mode<synchronous>, transform_indices = @transform_5, window_bounds = array<i64: 1, 128>}, {transform_indices = @transform_6, window_bounds = array<i64: 16, 128>}]} {
    %c0_i32 = arith.constant 0 : i32
    %0 = arith.cmpi eq, %arg1, %c0_i32 : i32
    %1 = arith.extui %0 : i1 to i32
    %c0_i32_0 = arith.constant 0 : i32
    %2 = arith.cmpi ne, %1, %c0_i32_0 : i32
    scf.if %2 {
      %cst_10 = arith.constant 0.000000e+00 : f32
      %12 = vector.broadcast %cst_10 : f32 to vector<16x32xf32>
      %c0_11 = arith.constant 0 : index
      %c0_12 = arith.constant 0 : index
      %13 = vector.load %arg9[%c0_11, %c0_12] : memref<16x32xf32, #tpu.memory_space<vmem>>, vector<16x32xf32>
      tpu.vector_store %arg9[%c0_11, %c0_12], %12 {strides = array<i32>} : memref<16x32xf32, #tpu.memory_space<vmem>>, vector<16x32xf32>,
    } else {
    }
    %c0 = arith.constant 0 : index
    %c0_1 = arith.constant 0 : index
    %3 = vector.load %arg9[%c0, %c0_1] : memref<16x32xf32, #tpu.memory_space<vmem>>, vector<16x32xf32>
    %c0_2 = arith.constant 0 : index
    %c0_3 = arith.constant 0 : index
    %4 = vector.load %arg2[%c0_2, %c0_3] : memref<16x64xbf16, #tpu.memory_space<vmem>>, vector<16x64xbf16>
    %c0_4 = arith.constant 0 : index
    %c0_5 = arith.constant 0 : index
    %5 = vector.load %arg3[%c0_4, %c0_5] : memref<64x32xbf16, #tpu.memory_space<vmem>>, vector<64x32xbf16>
    %cst = arith.constant dense<0.000000e+00> : vector<16x32xf32>
    %6 = tpu.matmul %4, %5, %cst {dimension_numbers = #tpu.dot_dimension_numbers<[1], [0], [0], [1], [0, 0, 1, 1], [], []>} : vector<16x64xbf16>, vector<64x32xbf16>, vector<16x32xf32> -> vector<16x32xf32>
    %7 = arith.addf %3, %6 : vector<16x32xf32>
    %c0_6 = arith.constant 0 : index
    %c0_7 = arith.constant 0 : index
    %8 = vector.load %arg9[%c0_6, %c0_7] : memref<16x32xf32, #tpu.memory_space<vmem>>, vector<16x32xf32>
    tpu.vector_store %arg9[%c0_6, %c0_7], %7 {strides = array<i32>} : memref<16x32xf32, #tpu.memory_space<vmem>>, vector<16x32xf32>,
    %c0_i32_8 = arith.constant 0 : i32
    %9 = arith.cmpi eq, %arg1, %c0_i32_8 : i32
    %10 = arith.extui %9 : i1 to i32
    %c0_i32_9 = arith.constant 0 : i32
    %11 = arith.cmpi ne, %10, %c0_i32_9 : i32
    scf.if %11 {
      %c0_10 = arith.constant 0 : index
      %c0_11 = arith.constant 0 : index
      %12 = vector.load %arg9[%c0_10, %c0_11] : memref<16x32xf32, #tpu.memory_space<vmem>>, vector<16x32xf32>
      %c0_12 = arith.constant 0 : index
      %c0_13 = arith.constant 0 : index
      %13 = vector.load %arg4[%c0_12, %c0_13] : memref<1x32xf32, #tpu.memory_space<vmem>>, vector<1x32xf32>
      %14 = vector.broadcast %13 : vector<1x32xf32> to vector<16x32xf32>
      %15 = arith.addf %12, %14 : vector<16x32xf32>
      %c0_14 = arith.constant 0 : index
      %c0_15 = arith.constant 0 : index
      %16 = vector.load %arg5[%c0_14, %c0_15] : memref<16x32xf32, #tpu.memory_space<vmem>>, vector<16x32xf32>
      %17 = arith.addf %15, %16 : vector<16x32xf32>
      %18 = arith.truncf %17 : vector<16x32xf32> to vector<16x32xbf16>
      %c0_16 = arith.constant 0 : index
      %c0_17 = arith.constant 0 : index
      %19 = vector.load %arg6[%c0_16, %c0_17] : memref<32x128xbf16, #tpu.memory_space<vmem>>, vector<32x128xbf16>
      %cst_18 = arith.constant dense<0.000000e+00> : vector<16x128xf32>
      %20 = tpu.matmul %18, %19, %cst_18 {dimension_numbers = #tpu.dot_dimension_numbers<[1], [0], [0], [1], [0, 0, 1, 1], [], []>} : vector<16x32xbf16>, vector<32x128xbf16>, vector<16x128xf32> -> vector<16x128xf32>
      %c0_19 = arith.constant 0 : index
      %c0_20 = arith.constant 0 : index
      %21 = vector.load %arg7[%c0_19, %c0_20] : memref<1x128xf32, #tpu.memory_space<vmem>>, vector<1x128xf32>
      %22 = vector.broadcast %21 : vector<1x128xf32> to vector<16x128xf32>
      %23 = arith.addf %20, %22 : vector<16x128xf32>
      %c0_21 = arith.constant 0 : index
      %c0_22 = arith.constant 0 : index
      %24 = vector.load %arg8[%c0_21, %c0_22] : memref<16x128xf32, #tpu.memory_space<vmem>>, vector<16x128xf32>
      tpu.vector_store %arg8[%c0_21, %c0_22], %23 {strides = array<i32>} : memref<16x128xf32, #tpu.memory_space<vmem>>, vector<16x128xf32>,
    } else {
    }
    return
  }
  func.func @transform_0(%arg0: i32, %arg1: i32) -> (i32, i32) {
    %c0_i32 = arith.constant 0 : i32
    return %arg0, %arg1 : i32, i32
  }
  func.func @transform_1(%arg0: i32, %arg1: i32) -> (i32, i32) {
    %c0_i32 = arith.constant 0 : i32
    %c0_i32_0 = arith.constant 0 : i32
    return %arg1, %c0_i32 : i32, i32
  }
  func.func @transform_2(%arg0: i32, %arg1: i32) -> (i32, i32) {
    %c0_i32 = arith.constant 0 : i32
    %c0_i32_0 = arith.constant 0 : i32
    %c0_i32_1 = arith.constant 0 : i32
    return %c0_i32, %c0_i32_0 : i32, i32
  }
  func.func @transform_3(%arg0: i32, %arg1: i32) -> (i32, i32) {
    %c0_i32 = arith.constant 0 : i32
    %c0_i32_0 = arith.constant 0 : i32
    return %arg0, %c0_i32 : i32, i32
  }
  func.func @transform_4(%arg0: i32, %arg1: i32) -> (i32, i32) {
    %c0_i32 = arith.constant 0 : i32
    %c0_i32_0 = arith.constant 0 : i32
    %c0_i32_1 = arith.constant 0 : i32
    return %c0_i32, %c0_i32_0 : i32, i32
  }
  func.func @transform_5(%arg0: i32, %arg1: i32) -> (i32, i32) {
    %c0_i32 = arith.constant 0 : i32
    %c0_i32_0 = arith.constant 0 : i32
    %c0_i32_1 = arith.constant 0 : i32
    return %c0_i32, %c0_i32_0 : i32, i32
  }
  func.func @transform_6(%arg0: i32, %arg1: i32) -> (i32, i32) {
    %c0_i32 = arith.constant 0 : i32
    %c0_i32_0 = arith.constant 0 : i32
    return %arg0, %c0_i32 : i32, i32
  }
}

</mosaic_0001>

<bundles_post_ra>
// kernel: custom_model_forward.8
= control target key start
LH: loop header
LB: loop body
LE: loop exit
PB: predicated region body
PF: predicated region fallthrough
CT: control target
= control target key end

     0   :  { %v152_v0 = vmov 0.0   ;;  %vm153_vm0 = vmmov 0   ;;  %vm45_vm1 = vcmask 261120   ;;  %vm116_vm2 = vcmask 519168   ;;  %s192_s1 = inlined_call_operand.vmem [shape: bf16[32,64], index: 1, kind: input, shape index: {}]   ;;  %s193_s0 = inlined_call_operand.vmem [shape: bf16[16,32], index: 0, kind: input, shape index: {}]   ;;  %s194_s2 = inlined_call_operand.vmem [shape: f32[1,64], index: 2, kind: input, shape index: {}]   ;;  %s195_s3 = inlined_call_operand.vmem [shape: bf16[16,64], index: 3, kind: output, shape index: {}]  }
   0x1   :  { %135 = vmatprep.subr.bf16.mxu0 %v152_v0  ;;  %v145_v1 = vld [vmem:[%s192_s1 + $0x8] sm:$0xff]   ;;  %139 = vmatprep.mubr.msk.bf16.mxu0 %vm153_vm0, %v152_v0  ;;  %v146_v2 = vld [vmem:[%s192_s1] sm:$0xff]  }
   0x2   :  { %136 = vmatpush3.bf16.msra.mxu0 %v145_v1  ;;  %v147_v3 = vld [vmem:[%s193_s0] sm:$0xff]  }
   0x3   :  { %137 = vmatprep.subr.bf16.mxu0 %v152_v0  ;;  %v123_v4 = vld [vmem:[%s194_s2] ss:$0 sm:$0xff] }
   0x6   :  { %138 = vmatpush3.bf16.msra.mxu0 %v146_v2 }
   0x9   :  { %140 = vmatmul.mubr.msk.bf16.vlgmr.msra.gmra.mxu0 %vm45_vm1, %v147_v3 }
  0xc9   :  { %v83_v5 = vpop.f32.mrf.mxu0 }
  0xca   :  { %v84_v6 = vadd.f32 %v123_v4, %v83_v5 }
  0xcb   :  { %v141_v7 = vpop.f32.mrf.mxu0 }
  0xcc   :  { %v90_v8 = vmul.f32 %v84_v6, %v84_v6 }
  0xcd   :  { %v86_v9 = vpop.f32.mrf.mxu0 }
  0xce   :  { %v92_v10 = vmul.f32 %v90_v8, %v84_v6  ;;  %v87_v11 = vadd.f32 %v123_v4, %v86_v9 }
  0xcf   :  { %v142_v12 = vpop.f32.mrf.mxu0 }
  0xd0   :  { %v94_v13 = vmul.f32 0.044715, %v92_v10  ;;  %v91_v14 = vmul.f32 %v87_v11, %v87_v11 }
  0xd2   :  { %v96_v15 = vadd.f32 %v94_v13, %v84_v6  ;;  %v93_v16 = vmul.f32 %v91_v14, %v87_v11 }
  0xd4   :  { %v98_v17 = vmul.f32 0.7978846, %v96_v15  ;;  %v95_v18 = vmul.f32 0.044715, %v93_v16 }
  0xd6   :  { %148 = vtanh.f32 %v98_v17  ;;  %v97_v19 = vadd.f32 %v95_v18, %v87_v11 }
  0xd8   :  { %v99_v20 = vmul.f32 0.7978846, %v97_v19 }
  0xda   :  { %150 = vtanh.f32 %v99_v20 }
  0xe3   :  { %v149_v21 = vpop.eup %148 }
  0xe4   :  { %v102_v22 = vadd.f32 1.0, %v149_v21 }
  0xe6   :  { %v104_v23 = vmul.f32 0.5, %v102_v22 }
  0xe7   :  { %v151_v24 = vpop.eup %150 }
  0xe8   :  { %v106_v25 = vmul.f32 %v104_v23, %v84_v6  ;;  %v103_v26 = vadd.f32 1.0, %v151_v24 }
  0xea   :  { %v130_v27 = vpack.c.bf16 %v106_v25, %v106_v25  ;;  %v105_v28 = vmul.f32 0.5, %v103_v26 }
  0xec   :  { %117 = vst.msk [vmem:[%s195_s3] sm:$0xf] %vm116_vm2, %v130_v27  ;;  %v107_v29 = vmul.f32 %v105_v28, %v87_v11 }
  0xee   :  { %v131_v30 = vpack.c.bf16 %v107_v29, %v107_v29 }
  0xf0   :  { %118 = vst.msk [vmem:[%s195_s3 + $0x4] sm:$0xf] %vm116_vm2, %v131_v30 }

// kernel: custom_model_forward.5
= control target key start
LH: loop header
LB: loop body
LE: loop exit
PB: predicated region body
PF: predicated region fallthrough
CT: control target
= control target key end

     0   :  { %vm27_vm0 = vcmask 261120   ;;  %v209_v15 = vmov 0.0   ;;  %vm210_vm1 = vmmov 0   ;;  %vm81_vm2 = vcmask 257024   ;;  %s273_s0 = inlined_call_operand.vmem [shape: f32[16,32], index: 0, kind: input, shape index: {}]   ;;  %s274_s3 = inlined_call_operand.vmem [shape: bf16[32,96], index: 3, kind: input, shape index: {}]   ;;  %s275_s1 = inlined_call_operand.vmem [shape: f32[1,32], index: 1, kind: input, shape index: {}]   ;;  %s276_s2 = inlined_call_operand.vmem [shape: f32[1,32], index: 2, kind: input, shape index: {}]   ;;  %s277_s4 = inlined_call_operand.vmem [shape: f32[1,96], index: 4, kind: input, shape index: {}]   ;;  %s278_s5 = inlined_call_operand.vmem [shape: bf16[16,96], index: 5, kind: output, shape index: {}]  }
   0x1   :  { %v25_v0 = vld [vmem:[%s273_s0] sm:$0xff]  ;;  %v26_v1 = vld [vmem:[%s273_s0 + $0x8] sm:$0xff]  ;;  %192 = vmatprep.subr.bf16.mxu0 %v209_v15  ;;  %196 = vmatprep.mubr.msk.bf16.mxu0 %vm210_vm1, %v209_v15  ;;  %vm167_vm3 = vcmask 781312  }
   0x2   :  { %v28_v2 = vsel %vm27_vm0, %v25_v0, 0.0  ;;  %v31_v3 = vsel %vm27_vm0, %v26_v1, 0.0  ;;  %v202_v14 = vld [vmem:[%s274_s3 + $0x8] sm:$0xff]   ;;  %v203_v16 = vld [vmem:[%s274_s3] sm:$0xff]  }
   0x3   :  { %29 = vadd.xlane.f32.xlu0 %v28_v2  ;;  %193 = vmatpush3.bf16.msra.mxu0 %v202_v14  ;;  %v174_v24 = vld [vmem:[%s275_s1] ss:$0 sm:$0xff] }
   0x4   :  { %194 = vmatprep.subr.bf16.mxu0 %v209_v15  ;;  %v175_v26 = vld [vmem:[%s276_s2] ss:$0 sm:$0xff] }
   0x5   :  { %v178_v36 = vld [vmem:[%s277_s4] ss:$0 sm:$0xff] }
   0x7   :  { %32 = vadd.xlane.f32.xlu0 %v31_v3  ;;  %195 = vmatpush3.bf16.msra.mxu0 %v203_v16 }
  0x8c   :  { %v30_v4 = vpop.xlane.xlu0 %29 }
  0x8d   :  { %v35_v5 = vmul.f32 0.03125, %v30_v4 }
  0x8f   :  { %v37_v6 = vsub.f32 %v25_v0, %v35_v5 }
  0x90   :  { %v33_v7 = vpop.xlane.xlu0 %32 }
  0x91   :  { %v36_v8 = vmul.f32 0.03125, %v33_v7  ;;  %v39_v9 = vmul.f32 %v37_v6, %v37_v6 }
  0x93   :  { %v38_v10 = vsub.f32 %v26_v1, %v36_v8  ;;  %v41_v11 = vsel %vm27_vm0, %v39_v9, 0.0 }
  0x94   :  { %42 = vadd.xlane.f32.xlu1 %v41_v11 }
  0x95   :  { %v40_v12 = vmul.f32 %v38_v10, %v38_v10 }
  0x97   :  { %v44_v13 = vsel %vm27_vm0, %v40_v12, 0.0 }
  0x98   :  { %45 = vadd.xlane.f32.xlu1 %v44_v13 }
 0x11d   :  { %v43_v17 = vpop.xlane.xlu1 %42 }
 0x11e   :  { %v47_v18 = vmul.f32 0.03125, %v43_v17 }
 0x120   :  { %v49_v19 = vadd.f32 1e-05, %v47_v18 }
 0x121   :  { %v46_v20 = vpop.xlane.xlu1 %45 }
 0x122   :  { %205 = vrsqrt.f32 %v49_v19  ;;  %v48_v21 = vmul.f32 0.03125, %v46_v20 }
 0x124   :  { %v50_v22 = vadd.f32 1e-05, %v48_v21 }
 0x126   :  { %207 = vrsqrt.f32 %v50_v22 }
 0x12f   :  { %v206_v23 = vpop.eup %205 }
 0x130   :  { %v53_v25 = vmul.f32 %v206_v23, %v37_v6 }
 0x132   :  { %v62_v27 = vmul.f32 %v174_v24, %v53_v25 }
 0x133   :  { %v208_v28 = vpop.eup %207 }
 0x134   :  { %v71_v29 = vadd.f32 %v175_v26, %v62_v27  ;;  %v54_v30 = vmul.f32 %v208_v28, %v38_v10 }
 0x136   :  { %v185_v31 = vpack.c.bf16 %v71_v29, %v71_v29  ;;  %v63_v32 = vmul.f32 %v174_v24, %v54_v30 }
 0x138   :  { %82 = vst.msk [vmem:[#allocation2] sm:$0xf] %vm81_vm2, %v185_v31  ;;  %v72_v33 = vadd.f32 %v175_v26, %v63_v32 }
 0x13a   :  { %v186_v34 = vpack.c.bf16 %v72_v33, %v72_v33 }
 0x13c   :  { %83 = vst.msk [vmem:[#allocation2 + $0x4] sm:$0xf] %vm81_vm2, %v186_v34 }
 0x143   :  { %v204_v35 = vld [vmem:[#allocation2] sm:$0xff]  }
 0x144   :  { %197 = vmatmul.mubr.msk.bf16.vlgmr.msra.gmra.mxu0 %vm27_vm0, %v204_v35 }
 0x204   :  { %v152_v37 = vpop.f32.mrf.mxu0 }
 0x205   :  { %v153_v38 = vadd.f32 %v178_v36, %v152_v37 }
 0x206   :  { %v198_v39 = vpop.f32.mrf.mxu0 }
 0x207   :  { %v187_v40 = vpack.c.bf16 %v153_v38, %v153_v38 }
 0x208   :  { %v155_v41 = vpop.f32.mrf.mxu0 }
 0x209   :  { %168 = vst.msk [vmem:[%s278_s5] sm:$0xf] %vm167_vm3, %v187_v40  ;;  %v156_v42 = vadd.f32 %v178_v36, %v155_v41 }
 0x20a   :  { %v199_v43 = vpop.f32.mrf.mxu0 }
 0x20b   :  { %v188_v44 = vpack.c.bf16 %v156_v42, %v156_v42 }
 0x20d   :  { %169 = vst.msk [vmem:[%s278_s5 + $0x4] sm:$0xf] %vm167_vm3, %v188_v44 }

// kernel: custom_model_forward.7
= control target key start
LH: loop header
LB: loop body
LE: loop exit
PB: predicated region body
PF: predicated region fallthrough
CT: control target
= control target key end

     0   :  { %vm30_vm0 = vcmask 261120   ;;  %v222_v0 = vmov 0.0   ;;  %vm223_vm1 = vmmov 0   ;;  %vm180_vm2 = vcmask 257024   ;;  %s311_s1 = inlined_call_operand.vmem [shape: bf16[32,32], index: 1, kind: input, shape index: {}]   ;;  %s312_s0 = inlined_call_operand.vmem [shape: bf16[16,32], index: 0, kind: input, shape index: {}]   ;;  %s313_s2 = inlined_call_operand.vmem [shape: f32[1,32], index: 2, kind: input, shape index: {}]   ;;  %s314_s3 = inlined_call_operand.vmem [shape: f32[16,32], index: 3, kind: input, shape index: {}]   ;;  %s315_s6 = inlined_call_operand.vmem [shape: f32[16,32], index: 6, kind: output, shape index: {0}]   ;;  %s316_s4 = inlined_call_operand.vmem [shape: f32[1,32], index: 4, kind: input, shape index: {}]   ;;  %s317_s5 = inlined_call_operand.vmem [shape: f32[1,32], index: 5, kind: input, shape index: {}]   ;;  %s318_s7 = inlined_call_operand.vmem [shape: bf16[16,32], index: 7, kind: output, shape index: {1}]  }
   0x1   :  { %205 = vmatprep.subr.bf16.mxu0 %v222_v0  ;;  %v215_v1 = vld [vmem:[%s311_s1 + $0x8] sm:$0xff]   ;;  %209 = vmatprep.mubr.msk.bf16.mxu0 %vm223_vm1, %v222_v0  ;;  %31 = vst.msk [vmem:[#allocation2] sm:$0xff] %vm30_vm0, %v222_v0  ;;  %32 = vst.msk [vmem:[#allocation2 + $0x8] sm:$0xff] %vm30_vm0, %v222_v0  ;;  %v216_v2 = vld [vmem:[%s311_s1] sm:$0xff]  }
   0x2   :  { %206 = vmatpush3.bf16.msra.mxu0 %v215_v1  ;;  %v217_v3 = vld [vmem:[%s312_s0] sm:$0xff]   ;;  %v122_v18 = vld [vmem:[%s314_s3 + $0x8] sm:$0xff] }
   0x3   :  { %207 = vmatprep.subr.bf16.mxu0 %v222_v0  ;;  %v195_v12 = vld [vmem:[%s313_s2] ss:$0 sm:$0xff] }
   0x4   :  { %v121_v14 = vld [vmem:[%s314_s3] sm:$0xff] }
   0x5   :  { %v196_v40 = vld [vmem:[%s316_s4] ss:$0 sm:$0xff] }
   0x6   :  { %208 = vmatpush3.bf16.msra.mxu0 %v216_v2  ;;  %v197_v42 = vld [vmem:[%s317_s5] ss:$0 sm:$0xff] }
   0x8   :  { %v33_v4 = vld [vmem:[#allocation2] sm:$0xff]  ;;  %v34_v8 = vld [vmem:[#allocation2 + $0x8] sm:$0xff] }
   0x9   :  { %210 = vmatmul.mubr.msk.bf16.vlgmr.msra.gmra.mxu0 %vm30_vm0, %v217_v3 }
  0xc9   :  { %v96_v5 = vpop.f32.mrf.mxu0 }
  0xca   :  { %v103_v6 = vadd.f32 %v96_v5, %v33_v4 }
  0xcb   :  { %v211_v7 = vpop.f32.mrf.mxu0 }
  0xcc   :  { %105 = vst.msk [vmem:[#allocation2] sm:$0xff] %vm30_vm0, %v103_v6 }
  0xcd   :  { %v99_v9 = vpop.f32.mrf.mxu0 }
  0xce   :  { %v104_v10 = vadd.f32 %v99_v9, %v34_v8 }
  0xcf   :  { %v212_v11 = vpop.f32.mrf.mxu0 }
  0xd0   :  { %106 = vst.msk [vmem:[#allocation2 + $0x8] sm:$0xff] %vm30_vm0, %v104_v10 }
  0xd3   :  { %v110_v13 = vld [vmem:[#allocation2] sm:$0xff] }
  0xd4   :  { %v119_v15 = vadd.f32 %v195_v12, %v110_v13 }
  0xd6   :  { %v123_v16 = vadd.f32 %v121_v14, %v119_v15 }
  0xd7   :  { %v111_v17 = vld [vmem:[#allocation2 + $0x8] sm:$0xff] }
  0xd8   :  { %v127_v19 = vsel %vm30_vm0, %v123_v16, 0.0  ;;  %125 = vst.msk [vmem:[%s315_s6] sm:$0xff] %vm30_vm0, %v123_v16  ;;  %v120_v20 = vadd.f32 %v195_v12, %v111_v17 }
  0xd9   :  { %128 = vadd.xlane.f32.xlu0 %v127_v19 }
  0xda   :  { %v124_v21 = vadd.f32 %v122_v18, %v120_v20 }
  0xdc   :  { %v130_v22 = vsel %vm30_vm0, %v124_v21, 0.0  ;;  %126 = vst.msk [vmem:[%s315_s6 + $0x8] sm:$0xff] %vm30_vm0, %v124_v21 }
  0xdd   :  { %131 = vadd.xlane.f32.xlu0 %v130_v22 }
 0x162   :  { %v129_v23 = vpop.xlane.xlu0 %128 }
 0x163   :  { %v134_v24 = vmul.f32 0.03125, %v129_v23 }
 0x165   :  { %v136_v25 = vsub.f32 %v123_v16, %v134_v24 }
 0x166   :  { %v132_v26 = vpop.xlane.xlu0 %131 }
 0x167   :  { %v135_v27 = vmul.f32 0.03125, %v132_v26  ;;  %v138_v28 = vmul.f32 %v136_v25, %v136_v25 }
 0x169   :  { %v137_v29 = vsub.f32 %v124_v21, %v135_v27  ;;  %v140_v30 = vsel %vm30_vm0, %v138_v28, 0.0 }
 0x16a   :  { %141 = vadd.xlane.f32.xlu1 %v140_v30 }
 0x16b   :  { %v139_v31 = vmul.f32 %v137_v29, %v137_v29 }
 0x16d   :  { %v143_v32 = vsel %vm30_vm0, %v139_v31, 0.0 }
 0x16e   :  { %144 = vadd.xlane.f32.xlu1 %v143_v32 }
 0x1f3   :  { %v142_v33 = vpop.xlane.xlu1 %141 }
 0x1f4   :  { %v146_v34 = vmul.f32 0.03125, %v142_v33 }
 0x1f6   :  { %v148_v35 = vadd.f32 1e-05, %v146_v34 }
 0x1f7   :  { %v145_v36 = vpop.xlane.xlu1 %144 }
 0x1f8   :  { %218 = vrsqrt.f32 %v148_v35  ;;  %v147_v37 = vmul.f32 0.03125, %v145_v36 }
 0x1fa   :  { %v149_v38 = vadd.f32 1e-05, %v147_v37 }
 0x1fc   :  { %220 = vrsqrt.f32 %v149_v38 }
 0x205   :  { %v219_v39 = vpop.eup %218 }
 0x206   :  { %v152_v41 = vmul.f32 %v219_v39, %v136_v25 }
 0x208   :  { %v161_v43 = vmul.f32 %v196_v40, %v152_v41 }
 0x209   :  { %v221_v44 = vpop.eup %220 }
 0x20a   :  { %v170_v45 = vadd.f32 %v197_v42, %v161_v43  ;;  %v153_v46 = vmul.f32 %v221_v44, %v137_v29 }
 0x20c   :  { %v200_v47 = vpack.c.bf16 %v170_v45, %v170_v45  ;;  %v162_v48 = vmul.f32 %v196_v40, %v153_v46 }
 0x20e   :  { %181 = vst.msk [vmem:[%s318_s7] sm:$0xf] %vm180_vm2, %v200_v47  ;;  %v171_v49 = vadd.f32 %v197_v42, %v162_v48 }
 0x210   :  { %v201_v50 = vpack.c.bf16 %v171_v49, %v171_v49 }
 0x212   :  { %182 = vst.msk [vmem:[%s318_s7 + $0x4] sm:$0xf] %vm180_vm2, %v201_v50 }

// kernel: custom_model_forward.6
= control target key start
LH: loop header
LB: loop body
LE: loop exit
PB: predicated region body
PF: predicated region fallthrough
CT: control target
= control target key end

     0   :  { %s1227_s12 = smov 0   ;;  %s1229_s13 = smov 0   ;;  %s1432_s0 = inlined_call_operand.vmem [shape: bf16[2,8,32], index: 0, kind: input, shape index: {}]   ;;  %s1433_s1 = inlined_call_operand.vmem [shape: bf16[2,8,64], index: 1, kind: input, shape index: {}]   ;;  %s1434_s2 = inlined_call_operand.vmem [shape: f32[2,1,8], index: 2, kind: input, shape index: {}]   ;;  %s1435_s3 = inlined_call_operand.vmem [shape: bf16[2,8,32], index: 3, kind: output, shape index: {}]  }
   0x1   :  { %s1231_s14 = smov 0  }
   0x2 LB: > { %s32_s15 = sadd.s32 1, %s1184_s13  ;;  %p1003_p0 = scmp.ge.s32.totalorder %s1188_s14, 1  ;;  %s1188_s14 = sphi %s1231_s14, %s13_s14   ;;  %s1184_s13 = sphi %s1229_s13, %s1437_s13   ;;  %s1180_s12 = sphi %s1227_s12, %s1436_s12  }
   0x3   : > { %p34_p1 = scmp.ge.s32.totalorder %s32_s15, 2  ;;  %p189_p2 = scmp.lt.s32.totalorder %s1188_s14, 3 }
   0x5   : > { %s1439_s15 = smov (%p34_p1, %s32_s15), 0  ;;  %p190_p3 = pnand %p1003_p0, %p189_p2 }
   0x6   : > { %p230_p4 = scmp.lt.s32.totalorder (!%p190_p3), %s1180_s12, 1  ;;  %s1194_s26 = smov (!%p190_p3), 96  }
   0x7   : > { %193 = sbr.rel (%p190_p3) target bundleno = 1377 (0x561), region = 32  ;;  %s1195_s27 = smov (!%p190_p3), 120  }
   0x8   : > { %s1196_s28 = smov (!%p190_p3), 112   ;;  %s1197_s29 = smov (!%p190_p3), 104  }
   0x9   : > { %s1200_s30 = smov (!%p190_p3), 88   ;;  %s1202_s4 = smov (!%p190_p3), 80  }
   0xa   : > { %s1203_s5 = smov (!%p190_p3), 72   ;;  %s1204_s6 = smov (!%p190_p3), 8  }
   0xb   : > { %s1205_s7 = smov (!%p190_p3), 16   ;;  %s1206_s8 = smov (!%p190_p3), 24  }
   0xc   : > { %v1190_v0 = vmov 0.0   ;;  %vm1191_vm0 = vmmov 0   ;;  %s1441_s12 = smov (!%p230_p4, %s1180_s12), 1  ;;  %vm276_vm1 = vcmask 64512   ;;  %vm262_vm2 = vcmask 31744  }
   0xd   : > { %1041 = vmatprep.subr.bf16.mxu0 %v1190_v0  ;;  %1043 = vmatprep.mubr.msk.bf16.mxu0 %vm1191_vm0, %v1190_v0  ;;  %s1251_s16 = sshll.u32 %s1441_s12, 2  ;;  %v1192_v4 = vmov -inf   ;;  %264 = vst.msk [vmem:[#allocation3] sm:$0xff] %vm262_vm2, %v1190_v0  ;;  %s249_s25 = scalar_lea.vmem %s1434_s2, %s1441_s12  ;;  %v1193_v12 = vmov 0   ;;  %vm345_vm3 = vcmask 7168   ;;  %vm363_vm4 = vcmask 1043456  }
   0xe   : > { %1047 = vmatprep.subr.bf16.mxu1 %v1190_v0  ;;  %1049 = vmatprep.mubr.msk.bf16.mxu1 %vm1191_vm0, %v1190_v0  ;;  %s1257_s19 = scalar_lea.vmem %s1433_s1, %s1251_s16  ;;  %s1264_s22 = scalar_lea.vmem %s1432_s0, %s1251_s16  ;;  %263 = vst.msk [vmem:[#allocation2] sm:$0xff] %vm262_vm2, %v1192_v4  ;;  %v1276_v5 = vld [vmem:[%s249_s25] ss:$0 sm:$0xff]  ;;  %v1198_v56 = vmov 1   ;;  %v1199_v63 = vmov 2   ;;  %vm490_vm5 = vcmask 15368  }
   0xf   : > { %v269_v1 = vld [vmem:[%s1257_s19] sm:$0xf]  ;;  %1130 = vset.pattern.permute.xlu0 %v1193_v12  ;;  %1131 = vset.pattern.permute.xlu1 %v1198_v56  ;;  %vm636_vm6 = vcmask 23568   ;;  %vm782_vm7 = vcmask 31768   ;;  %vm265_vm8 = vcmask 261120   ;;  %vm553_vm9 = vcmask 130112   ;;  %s256_s11 = scalar_lea.vmem %s1435_s3, %s1251_s16 }
  0x10   : > { %v281_v2 = vsel %vm276_vm1, %v269_v1, 0  ;;  %v268_v3 = vld [vmem:[%s1264_s22] sm:$0xf]  ;;  %v1009_v13 = vcombine.low %v269_v1, %v269_v1  ;;  %266 = vst.msk [vmem:[#allocation4] sm:$0xff] %vm265_vm8, %v1190_v0  ;;  %vm699_vm10 = vcmask 195712   ;;  %vm845_vm11 = vcmask 261312  }
  0x11   : > { %1042 = vmatpush3.bf16.xpose.msra.mxu0 %v281_v2  ;;  %v1282_v14 = vld [vmem:[%s1257_s19] ss:$0 sps:$4 sm:$0xff]   ;;  %vm893_vm12 = vcmask 257024  }
  0x12   : > { %1059 = vmatprep.subr.bf16.mxu0 %v1190_v0  ;;  %358 = vrot.lane.b32.xlu1 %v1009_v13, %s1194_s26  ;;  %v1143_v15 = vld [vmem:[%s1264_s22] ss:$0 sps:$4 sm:$0xff]  }
  0x13   : > { %v1287_v16 = vld [vmem:[%s1257_s19] ss:$0 sps:$4 sm:$0xff]  }
  0x14   : > { %v1145_v17 = vld [vmem:[%s1264_s22] ss:$0 sps:$4 sm:$0xff]  }
  0x15   : > { %v1292_v18 = vld [vmem:[%s1257_s19] ss:$0 sps:$4 sm:$0xff]  }
  0x16   : > { %420 = vrot.lane.b32.xlu1 %v1282_v14, %s1195_s27  ;;  %v1147_v19 = vld [vmem:[%s1264_s22] ss:$0 sps:$4 sm:$0xff]  }
  0x17   : > { %v1296_v20 = vld [vmem:[#allocation2] sm:$0xff] }
  0x18   : > { %1044 = vmatmul.mubr.msk.bf16.vlgmr.msra.gmra.mxu0 %vm276_vm1, %v268_v3 }
  0x19   : > { %1061 = vmatprep.mubr.msk.bf16.mxu0 %vm1191_vm0, %v1190_v0 }
  0x1a   : > { %415 = vrot.lane.b32.xlu1 %v1143_v15, %s1195_s27 }
  0x1e   : > { %566 = vrot.lane.b32.xlu1 %v1287_v16, %s1196_s28 }
  0x22   : > { %561 = vrot.lane.b32.xlu1 %v1145_v17, %s1196_s28 }
  0x26   : > { %712 = vrot.lane.b32.xlu1 %v1292_v18, %s1197_s29 }
  0x2a   : > { %707 = vrot.lane.b32.xlu1 %v1147_v19, %s1197_s29 }
  0x84   : > { %v359_v24 = vpop.permute.xlu1 %358 }
  0x85   : > { %v365_v25 = vsel %vm363_vm4, %v359_v24, 0 }
  0x86   : > { %1048 = vmatpush3.bf16.msra.mxu1 %v365_v25 }
  0x87   : > { %1053 = vmatprep.subr.bf16.mxu1 %v1190_v0 }
  0x88   : > { %v421_v29 = vpop.permute.xlu1 %420 }
  0x89   : > { %v426_v32 = vsel %vm276_vm1, %v421_v29, 0 }
  0x8c   : > { %v416_v30 = vpop.permute.xlu1 %415 }
  0x90   : > { %v567_v34 = vpop.permute.xlu1 %566 }
  0x91   : > { %v572_v36 = vsel %vm276_vm1, %v567_v34, 0 }
  0x94   : > { %v562_v35 = vpop.permute.xlu1 %561 }
  0x98   : > { %v713_v37 = vpop.permute.xlu1 %712 }
  0x99   : > { %v718_v38 = vsel %vm276_vm1, %v713_v37, 0 }
  0x9c   : > { %v708_v39 = vpop.permute.xlu1 %707 }
  0xd8   : > { %v317_v6 = vpop.f32.mrf.mxu0 }
  0xd9   : > { %v318_v7 = vadd.f32 %v1276_v5, %v317_v6  ;;  %v1201_v6 = vmov 3  }
  0xda   : > { %v1045_v8 = vpop.f32.mrf.mxu0 }
  0xdb   : > { %v324_v9 = vsel %vm276_vm1, %v318_v7, -inf }
  0xdc   : > { %325 = vmax.xlane.f32.xlu0 %v324_v9  ;;  %v320_v10 = vpop.f32.mrf.mxu0 }
  0xde   : > { %v1046_v11 = vpop.f32.mrf.mxu0 }
 0x165   : > { %v326_v21 = vpop.xlane.xlu0 %325 }
 0x166   : > { %v1299_v22 = vmax.f32 %v1296_v20, %v326_v21 }
 0x168   : > { %v328_v23 = vsub.f32 %v1296_v20, %v1299_v22  ;;  %409 = vst.msk [vmem:[#allocation2] sm:$0xff] %vm345_vm3, %v1299_v22  ;;  %333 = vperm.xlu0 %1130, %v1299_v22  }
 0x16a   : > { %v329_v15 = vmul.f32 1.442695, %v328_v23 }
 0x16c   : > { %1132 = vset.pattern.permute.xlu0 %v1199_v63 }
 0x16f   : > { %v1346_v2 = vld [vmem:[#allocation2] sm:$0xff] }
 0x1e3   : > { %v334_v26 = vpop.permute.xlu0 %333 }
 0x1e4   : > { %v336_v27 = vsub.f32 %v318_v7, %v334_v26 }
 0x1e6   : > { %v337_v28 = vmul.f32 1.442695, %v336_v27 }
 0x1e8   : > { %1148 = vpow2.f32 %v337_v28 }
 0x1e9   : > { %1150 = vpow2.f32 %v329_v15 }
 0x1f5   : > { %v1308_v31 = vpop.eup %1148 }
 0x1f6   : > { %v354_v33 = vpack.c.bf16 %v1308_v31, %v1308_v31  ;;  %v341_v17 = vsel %vm276_vm1, %v1308_v31, 0.0  ;;  %v1151_v19 = vpop.eup %1150 }
 0x1f8   : > { %1050 = vmatmul.mubr.msk.bf16.vlgmr.msra.gmra.mxu1 %vm276_vm1, %v354_v33 }
 0x1f9   : > { %1054 = vmatpush3.bf16.xpose.msra.mxu1 %v426_v32  ;;  %1055 = vmatprep.mubr.msk.bf16.mxu1 %vm1191_vm0, %v1190_v0 }
 0x1fa   : > { %1065 = vmatprep.subr.bf16.mxu1 %v1190_v0 }
 0x200   : > { %1056 = vmatmul.mubr.msk.bf16.vlgmr.msra.gmra.mxu1 %vm276_vm1, %v416_v30 }
 0x201   : > { %1066 = vmatpush3.bf16.xpose.msra.mxu1 %v572_v36  ;;  %1067 = vmatprep.mubr.msk.bf16.mxu1 %vm1191_vm0, %v1190_v0 }
 0x202   : > { %1077 = vmatprep.subr.bf16.mxu1 %v1190_v0 }
 0x208   : > { %1068 = vmatmul.mubr.msk.bf16.vlgmr.msra.gmra.mxu1 %vm276_vm1, %v562_v35 }
 0x209   : > { %1078 = vmatpush3.bf16.xpose.msra.mxu1 %v718_v38  ;;  %1079 = vmatprep.mubr.msk.bf16.mxu1 %vm1191_vm0, %v1190_v0 }
 0x210   : > { %1080 = vmatmul.mubr.msk.bf16.vlgmr.msra.gmra.mxu1 %vm276_vm1, %v708_v39 }
 0x2b8   : > { %v1327_v40 = vpop.f32.mrf.mxu1 }
 0x2ba   : > { %v1051_v41 = vpop.f32.mrf.mxu1 }
 0x2bc   : > { %v404_v42 = vpop.f32.mrf.mxu1 }
 0x2be   : > { %v1052_v43 = vpop.f32.mrf.mxu1 }
 0x2c0   : > { %v462_v44 = vpop.f32.mrf.mxu1 }
 0x2c1   : > { %v1330_v45 = vadd.f32 %v1276_v5, %v462_v44 }
 0x2c2   : > { %v1057_v46 = vpop.f32.mrf.mxu1 }
 0x2c3   : > { %v469_v47 = vsel %vm276_vm1, %v1330_v45, -inf }
 0x2c4   : > { %470 = vmax.xlane.f32.xlu1 %v469_v47  ;;  %v465_v48 = vpop.f32.mrf.mxu1  ;;  %v339_v47 = vld [vmem:[#allocation3] sm:$0xff] }
 0x2c5   : > { %v340_v48 = vmul.f32 %v1151_v19, %v339_v47 }
 0x2c6   : > { %v1058_v49 = vpop.f32.mrf.mxu1 }
 0x2c8   : > { %v608_v50 = vpop.f32.mrf.mxu1 }
 0x2c9   : > { %v1335_v51 = vadd.f32 %v1276_v5, %v608_v50 }
 0x2ca   : > { %v1069_v52 = vpop.f32.mrf.mxu1 }
 0x2cb   : > { %v615_v53 = vsel %vm276_vm1, %v1335_v51, -inf }
 0x2cc   : > { %616 = vmax.xlane.f32.xlu0 %v615_v53  ;;  %v611_v54 = vpop.f32.mrf.mxu1 }
 0x2ce   : > { %v1070_v55 = vpop.f32.mrf.mxu1 }
 0x2d0   : > { %v754_v57 = vpop.f32.mrf.mxu1 }
 0x2d1   : > { %v1341_v58 = vadd.f32 %v1276_v5, %v754_v57 }
 0x2d2   : > { %v1081_v59 = vpop.f32.mrf.mxu1 }
 0x2d3   : > { %v761_v60 = vsel %vm276_vm1, %v1341_v58, -inf }
 0x2d4   : > { %v757_v61 = vpop.f32.mrf.mxu1  ;;  %762 = vmax.xlane.f32.xlu1 %v761_v60 }
 0x2d6   : > { %v1082_v62 = vpop.f32.mrf.mxu1 }
 0x34d   : > { %v471_v1 = vpop.xlane.xlu1 %470 }
 0x34e   : > { %v1349_v3 = vmax.f32 %v1346_v2, %v471_v1 }
 0x350   : > { %v473_v4 = vsub.f32 %v1346_v2, %v1349_v3  ;;  %555 = vst.msk [vmem:[#allocation2] sm:$0xff] %vm490_vm5, %v1349_v3  ;;  %478 = vperm.xlu1 %1131, %v1349_v3  }
 0x352   : > { %v474_v38 = vmul.f32 1.442695, %v473_v4 }
 0x354   : > { %500 = vrot.lane.b32.xlu1 %v1282_v14, %s1200_s30 }
 0x355   : > { %v617_v5 = vpop.xlane.xlu0 %616  ;;  %1133 = vset.pattern.permute.xlu1 %v1201_v6 }
 0x357   : > { %v1358_v7 = vld [vmem:[#allocation2] sm:$0xff] }
 0x358   : > { %v1361_v8 = vmax.f32 %v1358_v7, %v617_v5 }
 0x35a   : > { %v619_v9 = vsub.f32 %v1358_v7, %v1361_v8  ;;  %701 = vst.msk [vmem:[#allocation2] sm:$0xff] %vm636_vm6, %v1361_v8  ;;  %624 = vperm.xlu0 %1132, %v1361_v8  }
 0x35c   : > { %v620_v41 = vmul.f32 1.442695, %v619_v9 }
 0x35d   : > { %v763_v10 = vpop.xlane.xlu1 %762 }
 0x35e   : > { %1135 = vset.pattern.permute.xlu0 %v1198_v56 }
 0x361   : > { %v760_v11 = vld [vmem:[#allocation2] sm:$0xff] }
 0x362   : > { %v764_v13 = vmax.f32 %v760_v11, %v763_v10 }
 0x364   : > { %v765_v14 = vsub.f32 %v760_v11, %v764_v13  ;;  %847 = vst.msk [vmem:[#allocation2] sm:$0xff] %vm782_vm7, %v764_v13  ;;  %770 = vperm.xlu1 %1133, %v764_v13  }
 0x366   : > { %v766_v44 = vmul.f32 1.442695, %v765_v14 }
 0x368   : > { %646 = vrot.lane.b32.xlu1 %v1287_v16, %s1202_s4 }
 0x369   : > { %1134 = vset.pattern.permute.xlu1 %v1193_v12 }
 0x36c   : > { %792 = vrot.lane.b32.xlu1 %v1292_v18, %s1203_s5 }
 0x390   : > { %342 = vadd.xlane.f32.xlu1 %v341_v17 }
 0x3a1   : > { %350 = vperm.xlu1 %1134, %v1151_v19  }
 0x3cb   : > { %v479_v16 = vpop.permute.xlu1 %478 }
 0x3cc   : > { %v481_v12 = vsub.f32 %v1330_v45, %v479_v16 }
 0x3ce   : > { %v482_v21 = vmul.f32 1.442695, %v481_v12 }
 0x3cf   : > { %v501_v24 = vpop.permute.xlu1 %500 }
 0x3d0   : > { %1152 = vpow2.f32 %v482_v21  ;;  %v506_v18 = vsel %vm363_vm4, %v501_v24, 0 }
 0x3d1   : > { %1060 = vmatpush3.bf16.msra.mxu0 %v506_v18 }
 0x3d2   : > { %1071 = vmatprep.subr.bf16.mxu0 %v1190_v0 }
 0x3d5   : > { %v625_v20 = vpop.permute.xlu0 %624 }
 0x3d6   : > { %v627_v22 = vsub.f32 %v1335_v51, %v625_v20  ;;  %v347_v51 = vld [vmem:[#allocation4] sm:$0xff] }
 0x3d8   : > { %v628_v23 = vmul.f32 1.442695, %v627_v22 }
 0x3da   : > { %1154 = vpow2.f32 %v628_v23 }
 0x3dd   : > { %v1153_v25 = vpop.eup %1152 }
 0x3de   : > { %v486_v26 = vsel %vm276_vm1, %v1153_v25, 0.0  ;;  %v499_v27 = vpack.c.bf16 %v1153_v25, %v1153_v25 }
 0x3df   : > { %487 = vadd.xlane.f32.xlu0 %v486_v26  ;;  %v771_v28 = vpop.permute.xlu1 %770 }
 0x3e0   : > { %v773_v29 = vsub.f32 %v1341_v58, %v771_v28  ;;  %1062 = vmatmul.mubr.msk.bf16.vlgmr.msra.gmra.mxu0 %vm276_vm1, %v499_v27 }
 0x3e1   : > { %1073 = vmatprep.mubr.msk.bf16.mxu0 %vm1191_vm0, %v1190_v0 }
 0x3e2   : > { %v774_v30 = vmul.f32 1.442695, %v773_v29 }
 0x3e3   : > { %v647_v31 = vpop.permute.xlu1 %646 }
 0x3e4   : > { %1156 = vpow2.f32 %v774_v30  ;;  %v652_v32 = vsel %vm363_vm4, %v647_v31, 0 }
 0x3e5   : > { %1072 = vmatpush3.bf16.msra.mxu0 %v652_v32  ;;  %1158 = vpow2.f32 %v474_v38 }
 0x3e6   : > { %1083 = vmatprep.subr.bf16.mxu0 %v1190_v0  ;;  %1160 = vpow2.f32 %v620_v41 }
 0x3e7   : > { %v1155_v33 = vpop.eup %1154  ;;  %v793_v34 = vpop.permute.xlu1 %792  ;;  %1162 = vpow2.f32 %v766_v44 }
 0x3e8   : > { %v632_v35 = vsel %vm276_vm1, %v1155_v33, 0.0  ;;  %v645_v36 = vpack.c.bf16 %v1155_v33, %v1155_v33  ;;  %v798_v37 = vsel %vm363_vm4, %v793_v34, 0 }
 0x3e9   : > { %633 = vadd.xlane.f32.xlu0 %v632_v35 }
 0x3ea   : > { %1074 = vmatmul.mubr.msk.bf16.vlgmr.msra.gmra.mxu0 %vm276_vm1, %v645_v36 }
 0x3eb   : > { %1084 = vmatpush3.bf16.msra.mxu0 %v798_v37  ;;  %1085 = vmatprep.mubr.msk.bf16.mxu0 %vm1191_vm0, %v1190_v0 }
 0x3f1   : > { %v1157_v39 = vpop.eup %1156 }
 0x3f2   : > { %v778_v42 = vsel %vm276_vm1, %v1157_v39, 0.0  ;;  %v791_v43 = vpack.c.bf16 %v1157_v39, %v1157_v39  ;;  %v1159_v45 = vpop.eup %1158 }
 0x3f3   : > { %779 = vadd.xlane.f32.xlu1 %v778_v42  ;;  %v1161_v46 = vpop.eup %1160 }
 0x3f4   : > { %1086 = vmatmul.mubr.msk.bf16.vlgmr.msra.gmra.mxu0 %vm276_vm1, %v791_v43  ;;  %v1163_v0 = vpop.eup %1162 }
 0x3ff   : > { %495 = vperm.xlu0 %1135, %v1159_v45  }
 0x403   : > { %1136 = vset.pattern.permute.xlu0 %v1199_v63 }
 0x404   : > { %641 = vperm.xlu0 %1136, %v1161_v46  }
 0x408   : > { %1137 = vset.pattern.permute.xlu0 %v1201_v6 }
 0x409   : > { %787 = vperm.xlu0 %1137, %v1163_v0  }
 0x40d   : > { %1138 = vset.pattern.permute.xlu0 %v1198_v56 }
 0x419   : > { %v343_v49 = vpop.xlane.xlu1 %342 }
 0x41a   : > { %v344_v50 = vadd.f32 %v343_v49, %v340_v48 }
 0x41c   : > { %346 = vst.msk [vmem:[#allocation3] sm:$0xff] %vm345_vm3, %v344_v50 }
 0x41d   : > { %v351_v52 = vpop.permute.xlu1 %350 }
 0x41e   : > { %v353_v53 = vmul.f32 %v351_v52, %v347_v51 }
 0x420   : > { %v407_v54 = vadd.f32 %v1327_v40, %v353_v53 }
 0x422   : > { %408 = vst.msk [vmem:[#allocation4] sm:$0xff] %vm276_vm1, %v407_v54 }
 0x423   : > { %v484_v55 = vld [vmem:[#allocation3] sm:$0xff] }
 0x424   : > { %v485_v57 = vmul.f32 %v1159_v45, %v484_v55 }
 0x429   : > { %v492_v24 = vld [vmem:[#allocation4] sm:$0xff] }
 0x468   : > { %v488_v58 = vpop.xlane.xlu0 %487 }
 0x469   : > { %v489_v59 = vadd.f32 %v488_v58, %v485_v57 }
 0x46b   : > { %491 = vst.msk [vmem:[#allocation3] sm:$0xff] %vm490_vm5, %v489_v59 }
 0x472   : > { %v630_v56 = vld [vmem:[#allocation3] sm:$0xff]  ;;  %v634_v61 = vpop.xlane.xlu0 %633 }
 0x473   : > { %v631_v60 = vmul.f32 %v1161_v46, %v630_v56 }
 0x475   : > { %v635_v62 = vadd.f32 %v634_v61, %v631_v60 }
 0x477   : > { %637 = vst.msk [vmem:[#allocation3] sm:$0xff] %vm636_vm6, %v635_v62 }
 0x47a   : > { %v496_v21 = vpop.permute.xlu0 %495 }
 0x47b   : > { %v498_v18 = vmul.f32 %v496_v21, %v492_v24 }
 0x47c   : > { %v780_v3 = vpop.xlane.xlu1 %779 }
 0x47e   : > { %v776_v1 = vld [vmem:[#allocation3] sm:$0xff] }
 0x47f   : > { %v777_v2 = vmul.f32 %v1163_v0, %v776_v1  ;;  %v642_v23 = vpop.permute.xlu0 %641 }
 0x481   : > { %v781_v4 = vadd.f32 %v780_v3, %v777_v2 }
 0x483   : > { %783 = vst.msk [vmem:[#allocation3] sm:$0xff] %vm782_vm7, %v781_v4 }
 0x48a   : > { %v861_v40 = vld [vmem:[#allocation3] sm:$0xff] }
 0x48b   : > { %1164 = vrcp.f32 %v861_v40 }
 0x498   : > { %v1165_v5 = vpop.eup %1164 }
 0x499   : > { %866 = vperm.xlu0 %1138, %v1165_v5  }
 0x49d   : > { %1141 = vset.pattern.permute.xlu0 %v1201_v6 }
 0x4a0   : > { %v542_v7 = vpop.f32.mrf.mxu0 }
 0x4a1   : > { %549 = vrot.lane.b32.xlu1 %v542_v7, %s1204_s6 }
 0x4a2   : > { %v1063_v8 = vpop.f32.mrf.mxu0 }
 0x4a4   : > { %v545_v9 = vpop.f32.mrf.mxu0 }
 0x4a6   : > { %v1064_v10 = vpop.f32.mrf.mxu0 }
 0x4aa   : > { %v688_v11 = vpop.f32.mrf.mxu0 }
 0x4ab   : > { %695 = vrot.lane.b32.xlu1 %v688_v11, %s1205_s7 }
 0x4ac   : > { %v1075_v13 = vpop.f32.mrf.mxu0 }
 0x4ae   : > { %v691_v14 = vpop.f32.mrf.mxu0 }
 0x4b0   : > { %v1076_v15 = vpop.f32.mrf.mxu0 }
 0x4b4   : > { %v834_v17 = vpop.f32.mrf.mxu0 }
 0x4b5   : > { %841 = vrot.lane.b32.xlu1 %v834_v17, %s1206_s8 }
 0x4b6   : > { %v1087_v19 = vpop.f32.mrf.mxu0 }
 0x4b8   : > { %v837_v16 = vpop.f32.mrf.mxu0 }
 0x4b9   : > { %856 = vperm.xlu1 %1134, %v1165_v5  }
 0x4ba   : > { %v1088_v12 = vpop.f32.mrf.mxu0 }
 0x4bd   : > { %1139 = vset.pattern.permute.xlu1 %v1199_v63  ;;  %v788_v63 = vpop.permute.xlu0 %787 }
 0x4be   : > { %876 = vperm.xlu1 %1139, %v1165_v5  }
 0x4c2   : > { %1140 = vset.pattern.permute.xlu1 %v1201_v6 }
 0x4c3   : > { %886 = vperm.xlu1 %1140, %v1165_v5  }
 0x513   : > { %v550_v20 = vpop.permute.xlu1 %549 }
 0x514   : > { %v552_v22 = vadd.f32 %v550_v20, %v498_v18  ;;  %v867_v35 = vpop.permute.xlu0 %866 }
 0x516   : > { %554 = vst.msk [vmem:[#allocation4] sm:$0xff] %vm553_vm9, %v552_v22 }
 0x51d   : > { %v638_v25 = vld [vmem:[#allocation4] sm:$0xff]  ;;  %v696_v27 = vpop.permute.xlu1 %695 }
 0x51e   : > { %v644_v26 = vmul.f32 %v642_v23, %v638_v25 }
 0x520   : > { %v698_v28 = vadd.f32 %v696_v27, %v644_v26 }
 0x522   : > { %700 = vst.msk [vmem:[#allocation4] sm:$0xff] %vm699_vm10, %v698_v28 }
 0x527   : > { %v842_v30 = vpop.permute.xlu1 %841 }
 0x529   : > { %v784_v29 = vld [vmem:[#allocation4] sm:$0xff] }
 0x52a   : > { %v790_v6 = vmul.f32 %v788_v63, %v784_v29 }
 0x52c   : > { %v844_v31 = vadd.f32 %v842_v30, %v790_v6 }
 0x52e   : > { %846 = vst.msk [vmem:[#allocation4] sm:$0xff] %vm845_vm11, %v844_v31 }
 0x534   : > { %v857_v32 = vpop.permute.xlu1 %856 }
 0x535   : > { %v853_v33 = vld [vmem:[#allocation4] sm:$0xff] }
 0x536   : > { %v859_v34 = vmul.f32 %v857_v32, %v853_v33 }
 0x538   : > { %860 = vst.msk [vmem:[#allocation4] sm:$0xff] %vm276_vm1, %v859_v34 }
 0x539   : > { %v877_v39 = vpop.permute.xlu1 %876 }
 0x53e   : > { %v887_v43 = vpop.permute.xlu1 %886 }
 0x53f   : > { %v863_v36 = vld [vmem:[#allocation4] sm:$0xff] }
 0x540   : > { %v869_v37 = vmul.f32 %v867_v35, %v863_v36 }
 0x542   : > { %870 = vst.msk [vmem:[#allocation4] sm:$0xff] %vm553_vm9, %v869_v37 }
 0x549   : > { %v873_v38 = vld [vmem:[#allocation4] sm:$0xff] }
 0x54a   : > { %v879_v41 = vmul.f32 %v877_v39, %v873_v38 }
 0x54c   : > { %880 = vst.msk [vmem:[#allocation4] sm:$0xff] %vm699_vm10, %v879_v41 }
 0x553   : > { %v883_v42 = vld [vmem:[#allocation4] sm:$0xff] }
 0x554   : > { %v889_v44 = vmul.f32 %v887_v43, %v883_v42 }
 0x556   : > { %890 = vst.msk [vmem:[#allocation4] sm:$0xff] %vm845_vm11, %v889_v44 }
 0x55d   : > { %v891_v45 = vld [vmem:[#allocation4] sm:$0xff] }
 0x55e   : > { %v892_v46 = vpack.c.bf16 %v891_v45, %v891_v45 }
 0x560   : > { %894 = vst.msk [vmem:[%s256_s11] sm:$0xf] %vm893_vm12, %v892_v46 }
 0x561 PF: > { %s13_s14 = sadd.s32 1, %s1188_s14   ;;  %s1436_s12 = smov %s1184_s13 }
 0x562   : > { %p10_p5 = scmp.ge.s32.totalorder %s13_s14, 4   ;;  %s1437_s13 = smov %s1439_s15 }
 0x564   :  { %12 = sbr.rel (!%p10_p5) target bundleno = 2 (0x2), region = 76 }

// kernel: custom_model_forward.9
= control target key start
LH: loop header
LB: loop body
LE: loop exit
PB: predicated region body
PF: predicated region fallthrough
CT: control target
= control target key end

     0   :  { %vm28_vm0 = vcmask 261120   ;;  %v262_v0 = vmov 0.0   ;;  %vm263_vm1 = vmmov 0   ;;  %vm72_vm2 = vcmask 523264   ;;  %s343_s1 = inlined_call_operand.vmem [shape: bf16[64,32], index: 1, kind: input, shape index: {}]   ;;  %s344_s0 = inlined_call_operand.vmem [shape: bf16[16,64], index: 0, kind: input, shape index: {}]   ;;  %s345_s4 = inlined_call_operand.vmem [shape: bf16[32,128], index: 4, kind: input, shape index: {}]   ;;  %s346_s2 = inlined_call_operand.vmem [shape: f32[1,32], index: 2, kind: input, shape index: {}]   ;;  %s347_s3 = inlined_call_operand.vmem [shape: f32[16,32], index: 3, kind: input, shape index: {}]   ;;  %s348_s5 = inlined_call_operand.vmem [shape: f32[1,128], index: 5, kind: input, shape index: {}]   ;;  %s349_s6 = inlined_call_operand.vmem [shape: f32[16,128], index: 6, kind: output, shape index: {}]  }
   0x1   :  { %233 = vmatprep.subr.bf16.mxu0 %v262_v0  ;;  %v255_v1 = vld [vmem:[%s343_s1 + $0x18] sm:$0xff]   ;;  %241 = vmatprep.mubr.msk.bf16.mxu0 %vm263_vm1, %v262_v0  ;;  %29 = vst.msk [vmem:[#allocation2] sm:$0xff] %vm28_vm0, %v262_v0  ;;  %30 = vst.msk [vmem:[#allocation2 + $0x8] sm:$0xff] %vm28_vm0, %v262_v0  ;;  %v256_v2 = vld [vmem:[%s343_s1 + $0x10] sm:$0xff]  }
   0x2   :  { %245 = vmatprep.subr.bf16.mxu1 %v262_v0  ;;  %249 = vmatprep.mubr.msk.bf16.mxu1 %vm263_vm1, %v262_v0  ;;  %v257_v3 = vld [vmem:[%s343_s1 + $0x8] sm:$0xff]   ;;  %v258_v4 = vld [vmem:[%s343_s1] sm:$0xff]  }
   0x3   :  { %234 = vmatpush3.bf16.msra.mxu0 %v255_v1  ;;  %v259_v5 = vld [vmem:[%s344_s0] sm:$0xff]   ;;  %v260_v6 = vld [vmem:[%s345_s4 + $0x8] sm:$0xff]  }
   0x4   :  { %235 = vmatprep.subr.bf16.mxu0 %v262_v0  ;;  %246 = vmatpush3.bf16.msra.mxu1 %v260_v6  ;;  %v261_v7 = vld [vmem:[%s345_s4] sm:$0xff]   ;;  %v137_v21 = vld [vmem:[%s347_s3 + $0x8] sm:$0xff] }
   0x5   :  { %247 = vmatprep.subr.bf16.mxu1 %v262_v0  ;;  %v220_v17 = vld [vmem:[%s346_s2] ss:$0 sm:$0xff] }
   0x6   :  { %v136_v20 = vld [vmem:[%s347_s3] sm:$0xff] }
   0x7   :  { %236 = vmatpush3.bf16.msra.mxu0 %v256_v2  ;;  %v221_v26 = vld [vmem:[%s348_s5] ss:$0 sm:$0xff] }
   0x8   :  { %237 = vmatprep.subr.bf16.mxu0 %v262_v0  ;;  %248 = vmatpush3.bf16.msra.mxu1 %v261_v7  ;;  %v31_v8 = vld [vmem:[#allocation2] sm:$0xff]  ;;  %v32_v12 = vld [vmem:[#allocation2 + $0x8] sm:$0xff] }
   0xb   :  { %238 = vmatpush3.bf16.msra.mxu0 %v257_v3 }
   0xc   :  { %239 = vmatprep.subr.bf16.mxu0 %v262_v0 }
   0xf   :  { %240 = vmatpush3.bf16.msra.mxu0 %v258_v4 }
  0x12   :  { %242 = vmatmul.mubr.msk.bf16.vlgmr.msra.gmra.mxu0 %vm72_vm2, %v259_v5 }
  0xd2   :  { %v110_v9 = vpop.f32.mrf.mxu0 }
  0xd3   :  { %v117_v10 = vadd.f32 %v110_v9, %v31_v8 }
  0xd4   :  { %v243_v11 = vpop.f32.mrf.mxu0 }
  0xd5   :  { %120 = vst.msk [vmem:[#allocation2] sm:$0xff] %vm28_vm0, %v117_v10 }
  0xd6   :  { %v113_v13 = vpop.f32.mrf.mxu0 }
  0xd7   :  { %v118_v14 = vadd.f32 %v113_v13, %v32_v12 }
  0xd8   :  { %v244_v15 = vpop.f32.mrf.mxu0 }
  0xd9   :  { %121 = vst.msk [vmem:[#allocation2 + $0x8] sm:$0xff] %vm28_vm0, %v118_v14 }
  0xdc   :  { %v125_v16 = vld [vmem:[#allocation2] sm:$0xff] }
  0xdd   :  { %v134_v18 = vadd.f32 %v220_v17, %v125_v16 }
  0xdf   :  { %v138_v23 = vadd.f32 %v136_v20, %v134_v18 }
  0xe0   :  { %v126_v19 = vld [vmem:[#allocation2 + $0x8] sm:$0xff] }
  0xe1   :  { %v135_v22 = vadd.f32 %v220_v17, %v126_v19 }
  0xe3   :  { %v139_v24 = vadd.f32 %v137_v21, %v135_v22 }
  0xe5   :  { %v140_v25 = vpack.c.bf16 %v139_v24, %v138_v23 }
  0xe7   :  { %250 = vmatmul.mubr.msk.bf16.vlgmr.msra.gmra.mxu1 %vm28_vm0, %v140_v25 }
 0x1a7   :  { %v201_v27 = vpop.f32.mrf.mxu1 }
 0x1a8   :  { %v202_v28 = vadd.f32 %v221_v26, %v201_v27 }
 0x1a9   :  { %v251_v29 = vpop.f32.mrf.mxu1 }
 0x1aa   :  { %208 = vst [vmem:[%s349_s6] sm:$0xff] %v202_v28 }
 0x1ab   :  { %v204_v30 = vpop.f32.mrf.mxu1 }
 0x1ac   :  { %v205_v31 = vadd.f32 %v221_v26, %v204_v30 }
 0x1ad   :  { %v252_v32 = vpop.f32.mrf.mxu1 }
 0x1ae   :  { %209 = vst [vmem:[%s349_s6 + $0x8] sm:$0xff] %v205_v31 }

</bundles_post_ra>
